<compile_context>
chip_gen: v7x
topology: tpu7x:2x2x1
jax: 0.10.0
libtpu: 0.0.40
codegen_flags: <defaults>
</compile_context>

<pallas_src>
import functools

import jax
import jax.numpy as jnp
import numpy as np
from jax import lax
from jax.experimental import pallas as pl
from jax.experimental.pallas import tpu as pltpu


def _round_up(v, m):
    return (v + m - 1) // m * m


def _fused_subsample_kernel(p1_ref, w1_ref, b1_ref, w2_ref, b2_ref, out_ref, h1_ref,
                            *, tt2, num_f2):
    """Fused conv1(VPU) -> ReLU -> conv2(MXU) -> ReLU for one (batch, time-tile).

    p1_ref : (1, 1, F1, TT2+1, 18) parity-split conv1 patches (built on host from x)
             p1[f1, i, pt*9 + 3*kh + kw] = x[4*(tile0+i) + 2*pt + kh, 2*f1 + kw]
    w1_ref : (9, C)      conv1 weights, k = 3*kh + kw major
    b1_ref : (1, C)
    w2_ref : (9*C, C)    conv2 weights, rows ordered (kh, kw, ci)
    b2_ref : (1, C)
    out_ref: (1, 1, TT2, F2*C)      lanes ordered (f2-major, c-minor)
    h1_ref : (2, F1, TT2+1, C)      VMEM scratch: conv1 activation (never in HBM)
    """
    p1 = p1_ref[0, 0]                                     # (F1, I, 18)
    w1 = w1_ref[...]                                      # (9, C)   - loaded once
    b1 = b1_ref[...]                                      # (1, C)
    w2 = w2_ref[...]                                      # (9C, C)  - loaded once
    b2 = b2_ref[...]                                      # (1, C)

    # ---- conv1 + ReLU on the VPU: 2 x 9 unrolled broadcast multiply-adds ----------
    for pt in range(2):
        acc = p1[:, :, pt * 9:pt * 9 + 1] * w1[0:1, :]    # (F1, I, C)
        for k in range(1, 9):
            acc = acc + p1[:, :, pt * 9 + k:pt * 9 + k + 1] * w1[k:k + 1, :]
        h1_ref[pt] = jnp.maximum(acc + b1, 0.0)           # conv1 act stays in VMEM

    # ---- conv2 + ReLU on the MXU: per-f2 im2col (contiguous slices) + matmul ------
    blocks = []
    for f2 in range(num_f2):
        slabs = []
        for kh in range(3):
            pt = kh & 1                                   # time parity of conv1 row
            i0 = kh >> 1                                  # extra half-row offset
            for kw in range(3):
                slabs.append(h1_ref[pt, 2 * f2 + kw, i0:i0 + tt2, :])   # (TT2, C)
        p2 = jnp.concatenate(slabs, axis=-1)              # (TT2, 9*C), K order (kh,kw,ci)
        o = jnp.dot(p2, w2, preferred_element_type=jnp.float32)
        blocks.append(jnp.maximum(o + b2, 0.0))           # (TT2, C)
    # One dense store per tile: lanes = (f2-major, c-minor).
    out_ref[0, 0] = jnp.concatenate(blocks, axis=-1).astype(out_ref.dtype)


def convolution_subsampling(x, w1, b1, w2, b2, *, time_tile=128):
    """Pallas version of ConvolutionSubsampling.forward.  x: (B, T, F) -> (B, T2, C*F2)."""
    B, T, F = x.shape
    C = w1.shape[0]
    assert w1.shape == (C, 1, 3, 3) and w2.shape == (C, C, 3, 3)
    T1 = (T - 3) // 2 + 1
    F1 = (F - 3) // 2 + 1
    assert T1 >= 3 and F1 >= 3, "input too small for two stride-2 3x3 convs"
    T2 = (T1 - 3) // 2 + 1
    F2 = (F1 - 3) // 2 + 1

    TT2 = max(1, min(time_tile, T2))         # output time rows per tile
    nT = -(-T2 // TT2)                       # number of time tiles
    g_len = nT * TT2 + 1                     # conv1 half-rows needed globally (+1 halo)
    i_len = TT2 + 1                          # conv1 half-rows needed per tile

    # ---------------- host prep: parity-split im2col of x only (cheap) -------------
    t_pad = 4 * g_len + 4
    x_pad = jnp.pad(x, ((0, 0), (0, max(0, t_pad - T)), (0, 0)))
    per_pt = []
    for pt in range(2):
        taps = []
        for kh in range(3):
            for kw in range(3):
                a = x_pad[:, 2 * pt + kh::4, kw::2]       # strided gather done by XLA
                taps.append(a[:, :g_len, :F1])            # (B, g_len, F1)
        per_pt.append(jnp.stack(taps, axis=-1))           # (B, g_len, F1, 9)
    g = jnp.stack(per_pt, axis=3)                         # (B, g_len, F1, 2, 9)
    g = g.transpose(0, 2, 1, 3, 4).reshape(B, F1, g_len, 18)   # lane = pt*9 + k
    # Overlapping time windows (1-row halo, ~1% duplication of the *smallest* tensor).
    p1 = jnp.stack([g[:, :, j * TT2:j * TT2 + i_len, :] for j in range(nT)], axis=1)
    # p1: (B, nT, F1, i_len, 18)

    w1f = w1.reshape(C, 9).T                              # (9, C), rows k = 3*kh+kw
    w2f = jnp.transpose(w2, (2, 3, 1, 0)).reshape(9 * C, C)   # rows (kh, kw, ci)
    b1r = b1.reshape(1, C)
    b2r = b2.reshape(1, C)

    # ---------------- VMEM budget (double-buffered blocks + scratch) ---------------
    def _buf_bytes(rows, cols):
        return _round_up(max(rows, 1), 8) * _round_up(max(cols, 1), 128) * 4

    vmem_need = (2 * F1 * _buf_bytes(i_len, 18)           # p1 block, double-buffered
                 + 2 * _buf_bytes(TT2, F2 * C)            # out block, double-buffered
                 + 2 * F1 * _buf_bytes(i_len, C)          # h1 scratch
                 + _buf_bytes(TT2, 9 * C)                 # conv2 patch temporary
                 + _buf_bytes(9, C) + _buf_bytes(9 * C, C) + 2 * _buf_bytes(1, C))
    vmem_limit = int(min(max(2 * vmem_need + (8 << 20), 32 << 20), 96 << 20))

    flops = (2 * 9 * C * (B * nT * 2 * F1 * i_len)        # conv1 (VPU)
             + 2 * (9 * C) * C * (B * nT * TT2 * F2))     # conv2 (MXU)
    bytes_accessed = 4 * (p1.size + B * nT * TT2 * F2 * C + w1f.size + w2f.size + 2 * C)

    kern = functools.partial(_fused_subsample_kernel, tt2=TT2, num_f2=F2)

    out = pl.pallas_call(
        kern,
        out_shape=jax.ShapeDtypeStruct((B, nT, TT2, F2 * C), jnp.float32),
        grid=(B, nT),
        in_specs=[
            pl.BlockSpec((1, 1, F1, i_len, 18), lambda b, j: (b, j, 0, 0, 0)),
            pl.BlockSpec((9, C), lambda b, j: (0, 0)),
            pl.BlockSpec((1, C), lambda b, j: (0, 0)),
            pl.BlockSpec((9 * C, C), lambda b, j: (0, 0)),
            pl.BlockSpec((1, C), lambda b, j: (0, 0)),
        ],
        out_specs=pl.BlockSpec((1, 1, TT2, F2 * C), lambda b, j: (b, j, 0, 0)),
        scratch_shapes=[pltpu.VMEM((2, F1, i_len, C), jnp.float32)],
        compiler_params=pltpu.CompilerParams(
            dimension_semantics=("parallel", "parallel"),
            vmem_limit_bytes=vmem_limit,
        ),
        cost_estimate=pl.CostEstimate(
            flops=int(flops), transcendentals=0, bytes_accessed=int(bytes_accessed)),
    )(p1, w1f, b1r, w2f, b2r)

    # (B, nT, TT2, F2*C) -> (B, T2, C*F2): drop padded tail rows, interleave (c, f2).
    out = out.reshape(B, nT * TT2, F2, C)[:, :T2]
    return jnp.transpose(out, (0, 1, 3, 2)).reshape(B, T2, C * F2)


def _reference(x, w1, b1, w2, b2):
    dn = ("NCHW", "OIHW", "NCHW")
    h = lax.conv_general_dilated(x[:, None], w1, (2, 2), "VALID", dimension_numbers=dn,
                                 precision=lax.Precision.HIGHEST)
    h = jax.nn.relu(h + b1[None, :, None, None])
    h = lax.conv_general_dilated(h, w2, (2, 2), "VALID", dimension_numbers=dn,
                                 precision=lax.Precision.HIGHEST)
    h = jax.nn.relu(h + b2[None, :, None, None])
    B, C, T2, F2 = h.shape
    return h.transpose(0, 2, 1, 3).reshape(B, T2, C * F2)


def _init_conv_params(key, c_out, c_in):
    # PyTorch Conv2d default init: U(-1/sqrt(fan_in), 1/sqrt(fan_in)), fan_in = c_in*3*3
    kw_, kb_ = jax.random.split(key)
    bound = 1.0 / np.sqrt(c_in * 9)
    w = jax.random.uniform(kw_, (c_out, c_in, 3, 3), jnp.float32, -bound, bound)
    b = jax.random.uniform(kb_, (c_out,), jnp.float32, -bound, bound)
    return w, b


if __name__ == "__main__":
    key = jax.random.PRNGKey(0)
    kx, k1, k2 = jax.random.split(key, 3)

    B, T, F, C = 2, 32, 16, 8            # batch, time, freq, out_channels
    x = jax.random.normal(kx, (B, T, F), jnp.float32)
    w1, b1 = _init_conv_params(k1, C, 1)
    w2, b2 = _init_conv_params(k2, C, C)

    fn = jax.jit(convolution_subsampling, static_argnames=("time_tile",))
    ref = _reference(x, w1, b1, w2, b2)

    # Multi-tile path (T2=7, tile=4 -> 2 time tiles; exercises halo + padded tail).
    out = jax.block_until_ready(fn(x, w1, b1, w2, b2, time_tile=4))
    np.testing.assert_allclose(np.asarray(out), np.asarray(ref), rtol=1e-3, atol=1e-3)

    # Single-tile path (default tile covers all of T2).
    out2 = jax.block_until_ready(fn(x, w1, b1, w2, b2))
    np.testing.assert_allclose(np.asarray(out2), np.asarray(ref), rtol=1e-3, atol=1e-3)

    T1, F1 = (T - 3) // 2 + 1, (F - 3) // 2 + 1
    assert out.shape == (B, (T1 - 3) // 2 + 1, C * ((F1 - 3) // 2 + 1)), out.shape
    print("KERNEL_OK")
</pallas_src>

<mosaic_0001>
module attributes {stable_mosaic.version = 11 : i64} {
  func.func @_fused_subsample_kernel(%arg0: i32, %arg1: i32, %arg2: memref<1x1x7x5x18xf32, #tpu.memory_space<vmem>>, %arg3: memref<9x8xf32, #tpu.memory_space<vmem>>, %arg4: memref<1x8xf32, #tpu.memory_space<vmem>>, %arg5: memref<72x8xf32, #tpu.memory_space<vmem>>, %arg6: memref<1x8xf32, #tpu.memory_space<vmem>>, %arg7: memref<1x1x4x24xf32, #tpu.memory_space<vmem>>, %arg8: memref<2x7x5x8xf32, #tpu.memory_space<vmem>>) attributes {dimension_semantics = [#tpu.dimension_semantics<parallel>, #tpu.dimension_semantics<parallel>], iteration_bounds = array<i64: 2, 2>, scalar_prefetch = 0 : i64, scratch_operands = 1 : i64, tpu.core_type = #tpu.core_type<tc>, window_params = [{transform_indices = @transform_0, window_bounds = array<i64: 1, 1, 7, 5, 18>}, {pipeline_mode = #tpu.pipeline_mode<synchronous>, transform_indices = @transform_1, window_bounds = array<i64: 9, 8>}, {pipeline_mode = #tpu.pipeline_mode<synchronous>, transform_indices = @transform_2, window_bounds = array<i64: 1, 8>}, {pipeline_mode = #tpu.pipeline_mode<synchronous>, transform_indices = @transform_3, window_bounds = array<i64: 72, 8>}, {pipeline_mode = #tpu.pipeline_mode<synchronous>, transform_indices = @transform_4, window_bounds = array<i64: 1, 8>}, {transform_indices = @transform_5, window_bounds = array<i64: 1, 1, 4, 24>}]} {
    %c0 = arith.constant 0 : index
    %c0_0 = arith.constant 0 : index
    %c0_1 = arith.constant 0 : index
    %c0_2 = arith.constant 0 : index
    %c0_3 = arith.constant 0 : index
    %0 = vector.load %arg2[%c0, %c0_0, %c0_1, %c0_2, %c0_3] : memref<1x1x7x5x18xf32, #tpu.memory_space<vmem>>, vector<1x1x7x5x18xf32>
    %1 = vector.shape_cast %0 : vector<1x1x7x5x18xf32> to vector<7x5x18xf32>
    %c0_4 = arith.constant 0 : index
    %c0_5 = arith.constant 0 : index
    %2 = vector.load %arg3[%c0_4, %c0_5] : memref<9x8xf32, #tpu.memory_space<vmem>>, vector<9x8xf32>
    %c0_6 = arith.constant 0 : index
    %c0_7 = arith.constant 0 : index
    %3 = vector.load %arg4[%c0_6, %c0_7] : memref<1x8xf32, #tpu.memory_space<vmem>>, vector<1x8xf32>
    %c0_8 = arith.constant 0 : index
    %c0_9 = arith.constant 0 : index
    %4 = vector.load %arg5[%c0_8, %c0_9] : memref<72x8xf32, #tpu.memory_space<vmem>>, vector<72x8xf32>
    %c0_10 = arith.constant 0 : index
    %c0_11 = arith.constant 0 : index
    %5 = vector.load %arg6[%c0_10, %c0_11] : memref<1x8xf32, #tpu.memory_space<vmem>>, vector<1x8xf32>
    %6 = vector.extract_strided_slice %1 {offsets = [0, 0, 0], sizes = [7, 5, 1], strides = [1, 1, 1]} : vector<7x5x18xf32> to vector<7x5x1xf32>
    %7 = vector.extract_strided_slice %2 {offsets = [0, 0], sizes = [1, 8], strides = [1, 1]} : vector<9x8xf32> to vector<1x8xf32>
    %8 = vector.shape_cast %7 : vector<1x8xf32> to vector<1x1x8xf32>
    %9 = vector.broadcast %6 : vector<7x5x1xf32> to vector<7x5x8xf32>
    %10 = vector.broadcast %8 : vector<1x1x8xf32> to vector<7x5x8xf32>
    %11 = arith.mulf %9, %10 : vector<7x5x8xf32>
    %12 = vector.extract_strided_slice %1 {offsets = [0, 0, 1], sizes = [7, 5, 1], strides = [1, 1, 1]} : vector<7x5x18xf32> to vector<7x5x1xf32>
    %13 = vector.extract_strided_slice %2 {offsets = [1, 0], sizes = [1, 8], strides = [1, 1]} : vector<9x8xf32> to vector<1x8xf32>
    %14 = vector.shape_cast %13 : vector<1x8xf32> to vector<1x1x8xf32>
    %15 = vector.broadcast %12 : vector<7x5x1xf32> to vector<7x5x8xf32>
    %16 = vector.broadcast %14 : vector<1x1x8xf32> to vector<7x5x8xf32>
    %17 = arith.mulf %15, %16 : vector<7x5x8xf32>
    %18 = arith.addf %11, %17 : vector<7x5x8xf32>
    %19 = vector.extract_strided_slice %1 {offsets = [0, 0, 2], sizes = [7, 5, 1], strides = [1, 1, 1]} : vector<7x5x18xf32> to vector<7x5x1xf32>
    %20 = vector.extract_strided_slice %2 {offsets = [2, 0], sizes = [1, 8], strides = [1, 1]} : vector<9x8xf32> to vector<1x8xf32>
    %21 = vector.shape_cast %20 : vector<1x8xf32> to vector<1x1x8xf32>
    %22 = vector.broadcast %19 : vector<7x5x1xf32> to vector<7x5x8xf32>
    %23 = vector.broadcast %21 : vector<1x1x8xf32> to vector<7x5x8xf32>
    %24 = arith.mulf %22, %23 : vector<7x5x8xf32>
    %25 = arith.addf %18, %24 : vector<7x5x8xf32>
    %26 = vector.extract_strided_slice %1 {offsets = [0, 0, 3], sizes = [7, 5, 1], strides = [1, 1, 1]} : vector<7x5x18xf32> to vector<7x5x1xf32>
    %27 = vector.extract_strided_slice %2 {offsets = [3, 0], sizes = [1, 8], strides = [1, 1]} : vector<9x8xf32> to vector<1x8xf32>
    %28 = vector.shape_cast %27 : vector<1x8xf32> to vector<1x1x8xf32>
    %29 = vector.broadcast %26 : vector<7x5x1xf32> to vector<7x5x8xf32>
    %30 = vector.broadcast %28 : vector<1x1x8xf32> to vector<7x5x8xf32>
    %31 = arith.mulf %29, %30 : vector<7x5x8xf32>
    %32 = arith.addf %25, %31 : vector<7x5x8xf32>
    %33 = vector.extract_strided_slice %1 {offsets = [0, 0, 4], sizes = [7, 5, 1], strides = [1, 1, 1]} : vector<7x5x18xf32> to vector<7x5x1xf32>
    %34 = vector.extract_strided_slice %2 {offsets = [4, 0], sizes = [1, 8], strides = [1, 1]} : vector<9x8xf32> to vector<1x8xf32>
    %35 = vector.shape_cast %34 : vector<1x8xf32> to vector<1x1x8xf32>
    %36 = vector.broadcast %33 : vector<7x5x1xf32> to vector<7x5x8xf32>
    %37 = vector.broadcast %35 : vector<1x1x8xf32> to vector<7x5x8xf32>
    %38 = arith.mulf %36, %37 : vector<7x5x8xf32>
    %39 = arith.addf %32, %38 : vector<7x5x8xf32>
    %40 = vector.extract_strided_slice %1 {offsets = [0, 0, 5], sizes = [7, 5, 1], strides = [1, 1, 1]} : vector<7x5x18xf32> to vector<7x5x1xf32>
    %41 = vector.extract_strided_slice %2 {offsets = [5, 0], sizes = [1, 8], strides = [1, 1]} : vector<9x8xf32> to vector<1x8xf32>
    %42 = vector.shape_cast %41 : vector<1x8xf32> to vector<1x1x8xf32>
    %43 = vector.broadcast %40 : vector<7x5x1xf32> to vector<7x5x8xf32>
    %44 = vector.broadcast %42 : vector<1x1x8xf32> to vector<7x5x8xf32>
    %45 = arith.mulf %43, %44 : vector<7x5x8xf32>
    %46 = arith.addf %39, %45 : vector<7x5x8xf32>
    %47 = vector.extract_strided_slice %1 {offsets = [0, 0, 6], sizes = [7, 5, 1], strides = [1, 1, 1]} : vector<7x5x18xf32> to vector<7x5x1xf32>
    %48 = vector.extract_strided_slice %2 {offsets = [6, 0], sizes = [1, 8], strides = [1, 1]} : vector<9x8xf32> to vector<1x8xf32>
    %49 = vector.shape_cast %48 : vector<1x8xf32> to vector<1x1x8xf32>
    %50 = vector.broadcast %47 : vector<7x5x1xf32> to vector<7x5x8xf32>
    %51 = vector.broadcast %49 : vector<1x1x8xf32> to vector<7x5x8xf32>
    %52 = arith.mulf %50, %51 : vector<7x5x8xf32>
    %53 = arith.addf %46, %52 : vector<7x5x8xf32>
    %54 = vector.extract_strided_slice %1 {offsets = [0, 0, 7], sizes = [7, 5, 1], strides = [1, 1, 1]} : vector<7x5x18xf32> to vector<7x5x1xf32>
    %55 = vector.extract_strided_slice %2 {offsets = [7, 0], sizes = [1, 8], strides = [1, 1]} : vector<9x8xf32> to vector<1x8xf32>
    %56 = vector.shape_cast %55 : vector<1x8xf32> to vector<1x1x8xf32>
    %57 = vector.broadcast %54 : vector<7x5x1xf32> to vector<7x5x8xf32>
    %58 = vector.broadcast %56 : vector<1x1x8xf32> to vector<7x5x8xf32>
    %59 = arith.mulf %57, %58 : vector<7x5x8xf32>
    %60 = arith.addf %53, %59 : vector<7x5x8xf32>
    %61 = vector.extract_strided_slice %1 {offsets = [0, 0, 8], sizes = [7, 5, 1], strides = [1, 1, 1]} : vector<7x5x18xf32> to vector<7x5x1xf32>
    %62 = vector.extract_strided_slice %2 {offsets = [8, 0], sizes = [1, 8], strides = [1, 1]} : vector<9x8xf32> to vector<1x8xf32>
    %63 = vector.shape_cast %62 : vector<1x8xf32> to vector<1x1x8xf32>
    %64 = vector.broadcast %61 : vector<7x5x1xf32> to vector<7x5x8xf32>
    %65 = vector.broadcast %63 : vector<1x1x8xf32> to vector<7x5x8xf32>
    %66 = arith.mulf %64, %65 : vector<7x5x8xf32>
    %67 = arith.addf %60, %66 : vector<7x5x8xf32>
    %68 = vector.shape_cast %3 : vector<1x8xf32> to vector<1x1x8xf32>
    %69 = vector.broadcast %68 : vector<1x1x8xf32> to vector<7x5x8xf32>
    %70 = arith.addf %67, %69 : vector<7x5x8xf32>
    %cst = arith.constant 0.000000e+00 : f32
    %71 = vector.broadcast %cst : f32 to vector<7x5x8xf32>
    %72 = arith.maximumf %70, %71 : vector<7x5x8xf32>
    %c0_12 = arith.constant 0 : index
    %c0_13 = arith.constant 0 : index
    %c0_14 = arith.constant 0 : index
    %c0_15 = arith.constant 0 : index
    %73 = vector.load %arg8[%c0_12, %c0_13, %c0_14, %c0_15] : memref<2x7x5x8xf32, #tpu.memory_space<vmem>>, vector<1x7x5x8xf32>
    %74 = vector.shape_cast %73 : vector<1x7x5x8xf32> to vector<7x5x8xf32>
    %75 = vector.shape_cast %72 : vector<7x5x8xf32> to vector<1x7x5x8xf32>
    tpu.vector_store %arg8[%c0_12, %c0_13, %c0_14, %c0_15], %75 {strides = array<i32>} : memref<2x7x5x8xf32, #tpu.memory_space<vmem>>, vector<1x7x5x8xf32>,
    %76 = vector.extract_strided_slice %1 {offsets = [0, 0, 9], sizes = [7, 5, 1], strides = [1, 1, 1]} : vector<7x5x18xf32> to vector<7x5x1xf32>
    %77 = vector.extract_strided_slice %2 {offsets = [0, 0], sizes = [1, 8], strides = [1, 1]} : vector<9x8xf32> to vector<1x8xf32>
    %78 = vector.shape_cast %77 : vector<1x8xf32> to vector<1x1x8xf32>
    %79 = vector.broadcast %76 : vector<7x5x1xf32> to vector<7x5x8xf32>
    %80 = vector.broadcast %78 : vector<1x1x8xf32> to vector<7x5x8xf32>
    %81 = arith.mulf %79, %80 : vector<7x5x8xf32>
    %82 = vector.extract_strided_slice %1 {offsets = [0, 0, 10], sizes = [7, 5, 1], strides = [1, 1, 1]} : vector<7x5x18xf32> to vector<7x5x1xf32>
    %83 = vector.extract_strided_slice %2 {offsets = [1, 0], sizes = [1, 8], strides = [1, 1]} : vector<9x8xf32> to vector<1x8xf32>
    %84 = vector.shape_cast %83 : vector<1x8xf32> to vector<1x1x8xf32>
    %85 = vector.broadcast %82 : vector<7x5x1xf32> to vector<7x5x8xf32>
    %86 = vector.broadcast %84 : vector<1x1x8xf32> to vector<7x5x8xf32>
    %87 = arith.mulf %85, %86 : vector<7x5x8xf32>
    %88 = arith.addf %81, %87 : vector<7x5x8xf32>
    %89 = vector.extract_strided_slice %1 {offsets = [0, 0, 11], sizes = [7, 5, 1], strides = [1, 1, 1]} : vector<7x5x18xf32> to vector<7x5x1xf32>
    %90 = vector.extract_strided_slice %2 {offsets = [2, 0], sizes = [1, 8], strides = [1, 1]} : vector<9x8xf32> to vector<1x8xf32>
    %91 = vector.shape_cast %90 : vector<1x8xf32> to vector<1x1x8xf32>
    %92 = vector.broadcast %89 : vector<7x5x1xf32> to vector<7x5x8xf32>
    %93 = vector.broadcast %91 : vector<1x1x8xf32> to vector<7x5x8xf32>
    %94 = arith.mulf %92, %93 : vector<7x5x8xf32>
    %95 = arith.addf %88, %94 : vector<7x5x8xf32>
    %96 = vector.extract_strided_slice %1 {offsets = [0, 0, 12], sizes = [7, 5, 1], strides = [1, 1, 1]} : vector<7x5x18xf32> to vector<7x5x1xf32>
    %97 = vector.extract_strided_slice %2 {offsets = [3, 0], sizes = [1, 8], strides = [1, 1]} : vector<9x8xf32> to vector<1x8xf32>
    %98 = vector.shape_cast %97 : vector<1x8xf32> to vector<1x1x8xf32>
    %99 = vector.broadcast %96 : vector<7x5x1xf32> to vector<7x5x8xf32>
    %100 = vector.broadcast %98 : vector<1x1x8xf32> to vector<7x5x8xf32>
    %101 = arith.mulf %99, %100 : vector<7x5x8xf32>
    %102 = arith.addf %95, %101 : vector<7x5x8xf32>
    %103 = vector.extract_strided_slice %1 {offsets = [0, 0, 13], sizes = [7, 5, 1], strides = [1, 1, 1]} : vector<7x5x18xf32> to vector<7x5x1xf32>
    %104 = vector.extract_strided_slice %2 {offsets = [4, 0], sizes = [1, 8], strides = [1, 1]} : vector<9x8xf32> to vector<1x8xf32>
    %105 = vector.shape_cast %104 : vector<1x8xf32> to vector<1x1x8xf32>
    %106 = vector.broadcast %103 : vector<7x5x1xf32> to vector<7x5x8xf32>
    %107 = vector.broadcast %105 : vector<1x1x8xf32> to vector<7x5x8xf32>
    %108 = arith.mulf %106, %107 : vector<7x5x8xf32>
    %109 = arith.addf %102, %108 : vector<7x5x8xf32>
    %110 = vector.extract_strided_slice %1 {offsets = [0, 0, 14], sizes = [7, 5, 1], strides = [1, 1, 1]} : vector<7x5x18xf32> to vector<7x5x1xf32>
    %111 = vector.extract_strided_slice %2 {offsets = [5, 0], sizes = [1, 8], strides = [1, 1]} : vector<9x8xf32> to vector<1x8xf32>
    %112 = vector.shape_cast %111 : vector<1x8xf32> to vector<1x1x8xf32>
    %113 = vector.broadcast %110 : vector<7x5x1xf32> to vector<7x5x8xf32>
    %114 = vector.broadcast %112 : vector<1x1x8xf32> to vector<7x5x8xf32>
    %115 = arith.mulf %113, %114 : vector<7x5x8xf32>
    %116 = arith.addf %109, %115 : vector<7x5x8xf32>
    %117 = vector.extract_strided_slice %1 {offsets = [0, 0, 15], sizes = [7, 5, 1], strides = [1, 1, 1]} : vector<7x5x18xf32> to vector<7x5x1xf32>
    %118 = vector.extract_strided_slice %2 {offsets = [6, 0], sizes = [1, 8], strides = [1, 1]} : vector<9x8xf32> to vector<1x8xf32>
    %119 = vector.shape_cast %118 : vector<1x8xf32> to vector<1x1x8xf32>
    %120 = vector.broadcast %117 : vector<7x5x1xf32> to vector<7x5x8xf32>
    %121 = vector.broadcast %119 : vector<1x1x8xf32> to vector<7x5x8xf32>
    %122 = arith.mulf %120, %121 : vector<7x5x8xf32>
    %123 = arith.addf %116, %122 : vector<7x5x8xf32>
    %124 = vector.extract_strided_slice %1 {offsets = [0, 0, 16], sizes = [7, 5, 1], strides = [1, 1, 1]} : vector<7x5x18xf32> to vector<7x5x1xf32>
    %125 = vector.extract_strided_slice %2 {offsets = [7, 0], sizes = [1, 8], strides = [1, 1]} : vector<9x8xf32> to vector<1x8xf32>
    %126 = vector.shape_cast %125 : vector<1x8xf32> to vector<1x1x8xf32>
    %127 = vector.broadcast %124 : vector<7x5x1xf32> to vector<7x5x8xf32>
    %128 = vector.broadcast %126 : vector<1x1x8xf32> to vector<7x5x8xf32>
    %129 = arith.mulf %127, %128 : vector<7x5x8xf32>
    %130 = arith.addf %123, %129 : vector<7x5x8xf32>
    %131 = vector.extract_strided_slice %1 {offsets = [0, 0, 17], sizes = [7, 5, 1], strides = [1, 1, 1]} : vector<7x5x18xf32> to vector<7x5x1xf32>
    %132 = vector.extract_strided_slice %2 {offsets = [8, 0], sizes = [1, 8], strides = [1, 1]} : vector<9x8xf32> to vector<1x8xf32>
    %133 = vector.shape_cast %132 : vector<1x8xf32> to vector<1x1x8xf32>
    %134 = vector.broadcast %131 : vector<7x5x1xf32> to vector<7x5x8xf32>
    %135 = vector.broadcast %133 : vector<1x1x8xf32> to vector<7x5x8xf32>
    %136 = arith.mulf %134, %135 : vector<7x5x8xf32>
    %137 = arith.addf %130, %136 : vector<7x5x8xf32>
    %138 = vector.shape_cast %3 : vector<1x8xf32> to vector<1x1x8xf32>
    %139 = vector.broadcast %138 : vector<1x1x8xf32> to vector<7x5x8xf32>
    %140 = arith.addf %137, %139 : vector<7x5x8xf32>
    %cst_16 = arith.constant 0.000000e+00 : f32
    %141 = vector.broadcast %cst_16 : f32 to vector<7x5x8xf32>
    %142 = arith.maximumf %140, %141 : vector<7x5x8xf32>
    %c1 = arith.constant 1 : index
    %c0_17 = arith.constant 0 : index
    %c0_18 = arith.constant 0 : index
    %c0_19 = arith.constant 0 : index
    %143 = vector.load %arg8[%c1, %c0_17, %c0_18, %c0_19] : memref<2x7x5x8xf32, #tpu.memory_space<vmem>>, vector<1x7x5x8xf32>
    %144 = vector.shape_cast %143 : vector<1x7x5x8xf32> to vector<7x5x8xf32>
    %145 = vector.shape_cast %142 : vector<7x5x8xf32> to vector<1x7x5x8xf32>
    tpu.vector_store %arg8[%c1, %c0_17, %c0_18, %c0_19], %145 {strides = array<i32>} : memref<2x7x5x8xf32, #tpu.memory_space<vmem>>, vector<1x7x5x8xf32>,
    %c0_20 = arith.constant 0 : index
    %c0_21 = arith.constant 0 : index
    %c0_22 = arith.constant 0 : index
    %c0_23 = arith.constant 0 : index
    %146 = vector.load %arg8[%c0_20, %c0_21, %c0_22, %c0_23] : memref<2x7x5x8xf32, #tpu.memory_space<vmem>>, vector<1x1x4x8xf32>
    %147 = vector.shape_cast %146 : vector<1x1x4x8xf32> to vector<4x8xf32>
    %c0_24 = arith.constant 0 : index
    %c1_25 = arith.constant 1 : index
    %c0_26 = arith.constant 0 : index
    %c0_27 = arith.constant 0 : index
    %148 = vector.load %arg8[%c0_24, %c1_25, %c0_26, %c0_27] : memref<2x7x5x8xf32, #tpu.memory_space<vmem>>, vector<1x1x4x8xf32>
    %149 = vector.shape_cast %148 : vector<1x1x4x8xf32> to vector<4x8xf32>
    %c0_28 = arith.constant 0 : index
    %c2 = arith.constant 2 : index
    %c0_29 = arith.constant 0 : index
    %c0_30 = arith.constant 0 : index
    %150 = vector.load %arg8[%c0_28, %c2, %c0_29, %c0_30] : memref<2x7x5x8xf32, #tpu.memory_space<vmem>>, vector<1x1x4x8xf32>
    %151 = vector.shape_cast %150 : vector<1x1x4x8xf32> to vector<4x8xf32>
    %c1_31 = arith.constant 1 : index
    %c0_32 = arith.constant 0 : index
    %c0_33 = arith.constant 0 : index
    %c0_34 = arith.constant 0 : index
    %152 = vector.load %arg8[%c1_31, %c0_32, %c0_33, %c0_34] : memref<2x7x5x8xf32, #tpu.memory_space<vmem>>, vector<1x1x4x8xf32>
    %153 = vector.shape_cast %152 : vector<1x1x4x8xf32> to vector<4x8xf32>
    %c1_35 = arith.constant 1 : index
    %c1_36 = arith.constant 1 : index
    %c0_37 = arith.constant 0 : index
    %c0_38 = arith.constant 0 : index
    %154 = vector.load %arg8[%c1_35, %c1_36, %c0_37, %c0_38] : memref<2x7x5x8xf32, #tpu.memory_space<vmem>>, vector<1x1x4x8xf32>
    %155 = vector.shape_cast %154 : vector<1x1x4x8xf32> to vector<4x8xf32>
    %c1_39 = arith.constant 1 : index
    %c2_40 = arith.constant 2 : index
    %c0_41 = arith.constant 0 : index
    %c0_42 = arith.constant 0 : index
    %156 = vector.load %arg8[%c1_39, %c2_40, %c0_41, %c0_42] : memref<2x7x5x8xf32, #tpu.memory_space<vmem>>, vector<1x1x4x8xf32>
    %157 = vector.shape_cast %156 : vector<1x1x4x8xf32> to vector<4x8xf32>
    %c0_43 = arith.constant 0 : index
    %c0_44 = arith.constant 0 : index
    %c1_45 = arith.constant 1 : index
    %c0_46 = arith.constant 0 : index
    %158 = vector.load %arg8[%c0_43, %c0_44, %c1_45, %c0_46] : memref<2x7x5x8xf32, #tpu.memory_space<vmem>>, vector<1x1x4x8xf32>
    %159 = vector.shape_cast %158 : vector<1x1x4x8xf32> to vector<4x8xf32>
    %c0_47 = arith.constant 0 : index
    %c1_48 = arith.constant 1 : index
    %c1_49 = arith.constant 1 : index
    %c0_50 = arith.constant 0 : index
    %160 = vector.load %arg8[%c0_47, %c1_48, %c1_49, %c0_50] : memref<2x7x5x8xf32, #tpu.memory_space<vmem>>, vector<1x1x4x8xf32>
    %161 = vector.shape_cast %160 : vector<1x1x4x8xf32> to vector<4x8xf32>
    %c0_51 = arith.constant 0 : index
    %c2_52 = arith.constant 2 : index
    %c1_53 = arith.constant 1 : index
    %c0_54 = arith.constant 0 : index
    %162 = vector.load %arg8[%c0_51, %c2_52, %c1_53, %c0_54] : memref<2x7x5x8xf32, #tpu.memory_space<vmem>>, vector<1x1x4x8xf32>
    %163 = vector.shape_cast %162 : vector<1x1x4x8xf32> to vector<4x8xf32>
    %164 = tpu.concatenate %147, %149, %151, %153, %155, %157, %159, %161, %163 in 1 : vector<4x8xf32>, vector<4x8xf32>, vector<4x8xf32>, vector<4x8xf32>, vector<4x8xf32>, vector<4x8xf32>, vector<4x8xf32>, vector<4x8xf32>, vector<4x8xf32> -> vector<4x72xf32>
    %cst_55 = arith.constant dense<0.000000e+00> : vector<4x8xf32>
    %165 = tpu.matmul %164, %4, %cst_55 {dimension_numbers = #tpu.dot_dimension_numbers<[1], [0], [0], [1], [0, 0, 1, 1], [], []>} : vector<4x72xf32>, vector<72x8xf32>, vector<4x8xf32> -> vector<4x8xf32>
    %166 = vector.broadcast %5 : vector<1x8xf32> to vector<4x8xf32>
    %167 = arith.addf %165, %166 : vector<4x8xf32>
    %cst_56 = arith.constant 0.000000e+00 : f32
    %168 = vector.broadcast %cst_56 : f32 to vector<4x8xf32>
    %169 = arith.maximumf %167, %168 : vector<4x8xf32>
    %c0_57 = arith.constant 0 : index
    %c2_58 = arith.constant 2 : index
    %c0_59 = arith.constant 0 : index
    %c0_60 = arith.constant 0 : index
    %170 = vector.load %arg8[%c0_57, %c2_58, %c0_59, %c0_60] : memref<2x7x5x8xf32, #tpu.memory_space<vmem>>, vector<1x1x4x8xf32>
    %171 = vector.shape_cast %170 : vector<1x1x4x8xf32> to vector<4x8xf32>
    %c0_61 = arith.constant 0 : index
    %c3 = arith.constant 3 : index
    %c0_62 = arith.constant 0 : index
    %c0_63 = arith.constant 0 : index
    %172 = vector.load %arg8[%c0_61, %c3, %c0_62, %c0_63] : memref<2x7x5x8xf32, #tpu.memory_space<vmem>>, vector<1x1x4x8xf32>
    %173 = vector.shape_cast %172 : vector<1x1x4x8xf32> to vector<4x8xf32>
    %c0_64 = arith.constant 0 : index
    %c4 = arith.constant 4 : index
    %c0_65 = arith.constant 0 : index
    %c0_66 = arith.constant 0 : index
    %174 = vector.load %arg8[%c0_64, %c4, %c0_65, %c0_66] : memref<2x7x5x8xf32, #tpu.memory_space<vmem>>, vector<1x1x4x8xf32>
    %175 = vector.shape_cast %174 : vector<1x1x4x8xf32> to vector<4x8xf32>
    %c1_67 = arith.constant 1 : index
    %c2_68 = arith.constant 2 : index
    %c0_69 = arith.constant 0 : index
    %c0_70 = arith.constant 0 : index
    %176 = vector.load %arg8[%c1_67, %c2_68, %c0_69, %c0_70] : memref<2x7x5x8xf32, #tpu.memory_space<vmem>>, vector<1x1x4x8xf32>
    %177 = vector.shape_cast %176 : vector<1x1x4x8xf32> to vector<4x8xf32>
    %c1_71 = arith.constant 1 : index
    %c3_72 = arith.constant 3 : index
    %c0_73 = arith.constant 0 : index
    %c0_74 = arith.constant 0 : index
    %178 = vector.load %arg8[%c1_71, %c3_72, %c0_73, %c0_74] : memref<2x7x5x8xf32, #tpu.memory_space<vmem>>, vector<1x1x4x8xf32>
    %179 = vector.shape_cast %178 : vector<1x1x4x8xf32> to vector<4x8xf32>
    %c1_75 = arith.constant 1 : index
    %c4_76 = arith.constant 4 : index
    %c0_77 = arith.constant 0 : index
    %c0_78 = arith.constant 0 : index
    %180 = vector.load %arg8[%c1_75, %c4_76, %c0_77, %c0_78] : memref<2x7x5x8xf32, #tpu.memory_space<vmem>>, vector<1x1x4x8xf32>
    %181 = vector.shape_cast %180 : vector<1x1x4x8xf32> to vector<4x8xf32>
    %c0_79 = arith.constant 0 : index
    %c2_80 = arith.constant 2 : index
    %c1_81 = arith.constant 1 : index
    %c0_82 = arith.constant 0 : index
    %182 = vector.load %arg8[%c0_79, %c2_80, %c1_81, %c0_82] : memref<2x7x5x8xf32, #tpu.memory_space<vmem>>, vector<1x1x4x8xf32>
    %183 = vector.shape_cast %182 : vector<1x1x4x8xf32> to vector<4x8xf32>
    %c0_83 = arith.constant 0 : index
    %c3_84 = arith.constant 3 : index
    %c1_85 = arith.constant 1 : index
    %c0_86 = arith.constant 0 : index
    %184 = vector.load %arg8[%c0_83, %c3_84, %c1_85, %c0_86] : memref<2x7x5x8xf32, #tpu.memory_space<vmem>>, vector<1x1x4x8xf32>
    %185 = vector.shape_cast %184 : vector<1x1x4x8xf32> to vector<4x8xf32>
    %c0_87 = arith.constant 0 : index
    %c4_88 = arith.constant 4 : index
    %c1_89 = arith.constant 1 : index
    %c0_90 = arith.constant 0 : index
    %186 = vector.load %arg8[%c0_87, %c4_88, %c1_89, %c0_90] : memref<2x7x5x8xf32, #tpu.memory_space<vmem>>, vector<1x1x4x8xf32>
    %187 = vector.shape_cast %186 : vector<1x1x4x8xf32> to vector<4x8xf32>
    %188 = tpu.concatenate %171, %173, %175, %177, %179, %181, %183, %185, %187 in 1 : vector<4x8xf32>, vector<4x8xf32>, vector<4x8xf32>, vector<4x8xf32>, vector<4x8xf32>, vector<4x8xf32>, vector<4x8xf32>, vector<4x8xf32>, vector<4x8xf32> -> vector<4x72xf32>
    %cst_91 = arith.constant dense<0.000000e+00> : vector<4x8xf32>
    %189 = tpu.matmul %188, %4, %cst_91 {dimension_numbers = #tpu.dot_dimension_numbers<[1], [0], [0], [1], [0, 0, 1, 1], [], []>} : vector<4x72xf32>, vector<72x8xf32>, vector<4x8xf32> -> vector<4x8xf32>
    %190 = vector.broadcast %5 : vector<1x8xf32> to vector<4x8xf32>
    %191 = arith.addf %189, %190 : vector<4x8xf32>
    %cst_92 = arith.constant 0.000000e+00 : f32
    %192 = vector.broadcast %cst_92 : f32 to vector<4x8xf32>
    %193 = arith.maximumf %191, %192 : vector<4x8xf32>
    %c0_93 = arith.constant 0 : index
    %c4_94 = arith.constant 4 : index
    %c0_95 = arith.constant 0 : index
    %c0_96 = arith.constant 0 : index
    %194 = vector.load %arg8[%c0_93, %c4_94, %c0_95, %c0_96] : memref<2x7x5x8xf32, #tpu.memory_space<vmem>>, vector<1x1x4x8xf32>
    %195 = vector.shape_cast %194 : vector<1x1x4x8xf32> to vector<4x8xf32>
    %c0_97 = arith.constant 0 : index
    %c5 = arith.constant 5 : index
    %c0_98 = arith.constant 0 : index
    %c0_99 = arith.constant 0 : index
    %196 = vector.load %arg8[%c0_97, %c5, %c0_98, %c0_99] : memref<2x7x5x8xf32, #tpu.memory_space<vmem>>, vector<1x1x4x8xf32>
    %197 = vector.shape_cast %196 : vector<1x1x4x8xf32> to vector<4x8xf32>
    %c0_100 = arith.constant 0 : index
    %c6 = arith.constant 6 : index
    %c0_101 = arith.constant 0 : index
    %c0_102 = arith.constant 0 : index
    %198 = vector.load %arg8[%c0_100, %c6, %c0_101, %c0_102] : memref<2x7x5x8xf32, #tpu.memory_space<vmem>>, vector<1x1x4x8xf32>
    %199 = vector.shape_cast %198 : vector<1x1x4x8xf32> to vector<4x8xf32>
    %c1_103 = arith.constant 1 : index
    %c4_104 = arith.constant 4 : index
    %c0_105 = arith.constant 0 : index
    %c0_106 = arith.constant 0 : index
    %200 = vector.load %arg8[%c1_103, %c4_104, %c0_105, %c0_106] : memref<2x7x5x8xf32, #tpu.memory_space<vmem>>, vector<1x1x4x8xf32>
    %201 = vector.shape_cast %200 : vector<1x1x4x8xf32> to vector<4x8xf32>
    %c1_107 = arith.constant 1 : index
    %c5_108 = arith.constant 5 : index
    %c0_109 = arith.constant 0 : index
    %c0_110 = arith.constant 0 : index
    %202 = vector.load %arg8[%c1_107, %c5_108, %c0_109, %c0_110] : memref<2x7x5x8xf32, #tpu.memory_space<vmem>>, vector<1x1x4x8xf32>
    %203 = vector.shape_cast %202 : vector<1x1x4x8xf32> to vector<4x8xf32>
    %c1_111 = arith.constant 1 : index
    %c6_112 = arith.constant 6 : index
    %c0_113 = arith.constant 0 : index
    %c0_114 = arith.constant 0 : index
    %204 = vector.load %arg8[%c1_111, %c6_112, %c0_113, %c0_114] : memref<2x7x5x8xf32, #tpu.memory_space<vmem>>, vector<1x1x4x8xf32>
    %205 = vector.shape_cast %204 : vector<1x1x4x8xf32> to vector<4x8xf32>
    %c0_115 = arith.constant 0 : index
    %c4_116 = arith.constant 4 : index
    %c1_117 = arith.constant 1 : index
    %c0_118 = arith.constant 0 : index
    %206 = vector.load %arg8[%c0_115, %c4_116, %c1_117, %c0_118] : memref<2x7x5x8xf32, #tpu.memory_space<vmem>>, vector<1x1x4x8xf32>
    %207 = vector.shape_cast %206 : vector<1x1x4x8xf32> to vector<4x8xf32>
    %c0_119 = arith.constant 0 : index
    %c5_120 = arith.constant 5 : index
    %c1_121 = arith.constant 1 : index
    %c0_122 = arith.constant 0 : index
    %208 = vector.load %arg8[%c0_119, %c5_120, %c1_121, %c0_122] : memref<2x7x5x8xf32, #tpu.memory_space<vmem>>, vector<1x1x4x8xf32>
    %209 = vector.shape_cast %208 : vector<1x1x4x8xf32> to vector<4x8xf32>
    %c0_123 = arith.constant 0 : index
    %c6_124 = arith.constant 6 : index
    %c1_125 = arith.constant 1 : index
    %c0_126 = arith.constant 0 : index
    %210 = vector.load %arg8[%c0_123, %c6_124, %c1_125, %c0_126] : memref<2x7x5x8xf32, #tpu.memory_space<vmem>>, vector<1x1x4x8xf32>
    %211 = vector.shape_cast %210 : vector<1x1x4x8xf32> to vector<4x8xf32>
    %212 = tpu.concatenate %195, %197, %199, %201, %203, %205, %207, %209, %211 in 1 : vector<4x8xf32>, vector<4x8xf32>, vector<4x8xf32>, vector<4x8xf32>, vector<4x8xf32>, vector<4x8xf32>, vector<4x8xf32>, vector<4x8xf32>, vector<4x8xf32> -> vector<4x72xf32>
    %cst_127 = arith.constant dense<0.000000e+00> : vector<4x8xf32>
    %213 = tpu.matmul %212, %4, %cst_127 {dimension_numbers = #tpu.dot_dimension_numbers<[1], [0], [0], [1], [0, 0, 1, 1], [], []>} : vector<4x72xf32>, vector<72x8xf32>, vector<4x8xf32> -> vector<4x8xf32>
    %214 = vector.broadcast %5 : vector<1x8xf32> to vector<4x8xf32>
    %215 = arith.addf %213, %214 : vector<4x8xf32>
    %cst_128 = arith.constant 0.000000e+00 : f32
    %216 = vector.broadcast %cst_128 : f32 to vector<4x8xf32>
    %217 = arith.maximumf %215, %216 : vector<4x8xf32>
    %218 = tpu.concatenate %169, %193, %217 in 1 : vector<4x8xf32>, vector<4x8xf32>, vector<4x8xf32> -> vector<4x24xf32>
    %c0_129 = arith.constant 0 : index
    %c0_130 = arith.constant 0 : index
    %c0_131 = arith.constant 0 : index
    %c0_132 = arith.constant 0 : index
    %219 = vector.load %arg7[%c0_129, %c0_130, %c0_131, %c0_132] : memref<1x1x4x24xf32, #tpu.memory_space<vmem>>, vector<1x1x4x24xf32>
    %220 = vector.shape_cast %219 : vector<1x1x4x24xf32> to vector<4x24xf32>
    %221 = vector.shape_cast %218 : vector<4x24xf32> to vector<1x1x4x24xf32>
    tpu.vector_store %arg7[%c0_129, %c0_130, %c0_131, %c0_132], %221 {strides = array<i32>} : memref<1x1x4x24xf32, #tpu.memory_space<vmem>>, vector<1x1x4x24xf32>,
    return
  }
  func.func @transform_0(%arg0: i32, %arg1: i32) -> (i32, i32, i32, i32, i32) {
    %c0_i32 = arith.constant 0 : i32
    %c0_i32_0 = arith.constant 0 : i32
    %c0_i32_1 = arith.constant 0 : i32
    %c0_i32_2 = arith.constant 0 : i32
    return %arg0, %arg1, %c0_i32, %c0_i32_0, %c0_i32_1 : i32, i32, i32, i32, i32
  }
  func.func @transform_1(%arg0: i32, %arg1: i32) -> (i32, i32) {
    %c0_i32 = arith.constant 0 : i32
    %c0_i32_0 = arith.constant 0 : i32
    %c0_i32_1 = arith.constant 0 : i32
    return %c0_i32, %c0_i32_0 : i32, i32
  }
  func.func @transform_2(%arg0: i32, %arg1: i32) -> (i32, i32) {
    %c0_i32 = arith.constant 0 : i32
    %c0_i32_0 = arith.constant 0 : i32
    %c0_i32_1 = arith.constant 0 : i32
    return %c0_i32, %c0_i32_0 : i32, i32
  }
  func.func @transform_3(%arg0: i32, %arg1: i32) -> (i32, i32) {
    %c0_i32 = arith.constant 0 : i32
    %c0_i32_0 = arith.constant 0 : i32
    %c0_i32_1 = arith.constant 0 : i32
    return %c0_i32, %c0_i32_0 : i32, i32
  }
  func.func @transform_4(%arg0: i32, %arg1: i32) -> (i32, i32) {
    %c0_i32 = arith.constant 0 : i32
    %c0_i32_0 = arith.constant 0 : i32
    %c0_i32_1 = arith.constant 0 : i32
    return %c0_i32, %c0_i32_0 : i32, i32
  }
  func.func @transform_5(%arg0: i32, %arg1: i32) -> (i32, i32, i32, i32) {
    %c0_i32 = arith.constant 0 : i32
    %c0_i32_0 = arith.constant 0 : i32
    %c0_i32_1 = arith.constant 0 : i32
    return %arg0, %arg1, %c0_i32, %c0_i32_0 : i32, i32, i32, i32
  }
}

</mosaic_0001>

<bundles_post_ra>
// kernel: convolution_subsampling.1
= control target key start
LH: loop header
LB: loop body
LE: loop exit
PB: predicated region body
PF: predicated region fallthrough
CT: control target
= control target key end

     0   :  { %s1995_s18 = smov 0   ;;  %s1997_s19 = smov 0   ;;  %s2844_s0 = inlined_call_operand.vmem [shape: f32[2,2,7,5,18], index: 0, kind: input, shape index: {}]   ;;  %s2845_s1 = inlined_call_operand.vmem [shape: f32[9,8], index: 1, kind: input, shape index: {}]   ;;  %s2846_s2 = inlined_call_operand.vmem [shape: f32[1,8], index: 2, kind: input, shape index: {}]   ;;  %s2847_s3 = inlined_call_operand.vmem [shape: f32[72,8], index: 3, kind: input, shape index: {}]   ;;  %s2848_s4 = inlined_call_operand.vmem [shape: f32[1,8], index: 4, kind: input, shape index: {}]   ;;  %s2849_s5 = inlined_call_operand.vmem [shape: f32[2,2,4,24], index: 5, kind: output, shape index: {}]  }
   0x1   :  { %s1999_s20 = smov 0   ;;  %s2001_s21 = smov 0  }
   0x2   :  { %s2003_s22 = smov 0  }
   0x3 LB: > { %s24_s23 = sadd.s32 1, %s1926_s20  ;;  %s27_s24 = sadd.s32 1, %s1930_s21  ;;  %s1934_s22 = sphi %s2003_s22, %s15_s22   ;;  %s1930_s21 = sphi %s2001_s21, %s2937_s21   ;;  %s1926_s20 = sphi %s1999_s20, %s2936_s20   ;;  %s1922_s19 = sphi %s1997_s19, %s2935_s19   ;;  %s1918_s18 = sphi %s1995_s18, %s2934_s18  }
   0x4   : > { %p25_p0 = scmp.ge.s32.totalorder %s24_s23, 2  ;;  %p1605_p1 = scmp.ge.s32.totalorder %s1934_s22, 1 }
   0x5   : > { %p207_p2 = scmp.lt.s32.totalorder %s1934_s22, 5 }
   0x6   : > { %s2939_s23 = smov (%p25_p0, %s24_s23), 0  ;;  %s2941_s24 = smov (!%p25_p0, %s27_s24), %s1930_s21 }
   0x7   : > { %p208_p3 = pnand %p1605_p1, %p207_p2  ;;  %p29_p4 = scmp.ge.s32.totalorder %s2941_s24, 2 }
   0x9   : > { %s2943_s24 = smov (%p29_p4, %s2941_s24), 0  ;;  %211 = sbr.rel (%p208_p3) target bundleno = 994 (0x3e2), region = 40 }
  0x10   : > { %p242_p5 = scmp.lt.s32.totalorder %s1922_s19, 1  ;;  %p244_p6 = scmp.lt.s32.totalorder %s1918_s18, 1  ;;  %v1936_v0 = vmov 0   ;;  %v1937_v8 = vmov 1   ;;  %v1938_v9 = vmov 2   ;;  %v1939_v10 = vmov 3  }
  0x11   : > { %1818 = vset.pattern.permute.xlu1 %v1936_v0  ;;  %1817 = vset.pattern.permute.xlu0 %v1936_v0  ;;  %v2850_v11 = vmov 16   ;;  %v2856_v12 = vmov 17   ;;  %v1942_v13 = vmov 10   ;;  %v1943_v14 = vmov 9   ;;  %v2265_v0 = vld [vmem:[%s2845_s1] sm:$0xff]  ;;  %s1954_s13 = smov 8  }
  0x12   : > { %s2945_s19 = smov (!%p242_p5, %s1922_s19), 1  ;;  %s2947_s18 = smov (!%p244_p6, %s1918_s18), 1  ;;  %v1944_v15 = vmov 11   ;;  %v1945_v16 = vmov 4   ;;  %v2867_v17 = vmov 12   ;;  %v2865_v18 = vmov 5  }
  0x13   : > { %s1747_s25 = smul.u32 14, %s2945_s19  ;;  %v2863_v19 = vmov 13   ;;  %v2861_v20 = vmov 6   ;;  %v2857_v27 = vmov 7   ;;  %v2854_v30 = vmov 15   ;;  %s1955_s14 = smov 24  }
  0x14   : > { %s1746_s26 = smul.u32 7, %s2947_s18  ;;  %v2859_v37 = vmov 14   ;;  %v2852_v42 = vmov 8   ;;  %v314_v57 = vlaneseq  ;;  %vm713_vm0 = vcmask 61440   ;;  %s1956_s15 = smov 40  }
  0x15   : > { %s1957_s16 = smov 56   ;;  %s1960_s12 = smov 32   ;;  %vm1964_vm1 = vmmov 0   ;;  %vm1159_vm2 = vcmask 64512   ;;  %vm1161_vm3 = vcmask 130048   ;;  %vm1163_vm4 = vcmask 195584  }
  0x16   : > { %s248_s27 = sadd.s32 %s1747_s25, %s1746_s26  ;;  %v2251_v59 = vshrl.u32 %v314_v57, 7  ;;  %s1963_s7 = smov 64   ;;  %vm1165_vm5 = vcmask 261120   ;;  %vm1167_vm6 = vcmask 326656   ;;  %vm1169_vm7 = vcmask 392192  }
  0x17   : > { %s1606_s28 = sshll.u32 %s248_s27, 3  ;;  %vm1171_vm8 = vcmask 457728   ;;  %vm1173_vm9 = vcmask 523264   ;;  %vm1181_vm10 = vcmask 588800   ;;  %vm1510_vm11 = vcmask 191488  }
  0x18   : > { %s2034_s6 = scalar_lea.vmem %s2844_s0, %s1606_s28  ;;  %v316_v62 = vsub.s32 0, %v2251_v59  ;;  %s1961_s28 = smov 48  }
  0x19   : > { %v2037_v1 = vld [vmem:[%s2034_s6 + $0x10] sm:$0x1f]  ;;  %v2040_v2 = vld [vmem:[%s2034_s6] sm:$0x1f]  ;;  %v2045_v3 = vld [vmem:[%s2034_s6 + $0x18] sm:$0x1f] }
  0x1a   : > { %291 = vperm.xlu1 %1818, %v2037_v1   ;;  %281 = vperm.xlu0 %1817, %v2040_v2   ;;  %v2048_v4 = vld [vmem:[%s2034_s6 + $0x8] sm:$0x1f]  ;;  %v2056_v6 = vld [vmem:[%s2034_s6 + $0x20] sm:$0x1f]  ;;  %v2061_v7 = vld [vmem:[%s2034_s6 + $0x30] sm:$0x1f] }
  0x1b   : > { %v2053_v5 = vld [vmem:[%s2034_s6 + $0x28] sm:$0x1f] }
  0x1e   : > { %296 = vperm.xlu1 %1818, %v2045_v3   ;;  %286 = vperm.xlu0 %1817, %v2048_v4  }
  0x22   : > { %306 = vperm.xlu1 %1818, %v2053_v5   ;;  %301 = vperm.xlu0 %1817, %v2056_v6  }
  0x26   : > { %1819 = vset.pattern.permute.xlu1 %v1937_v8  ;;  %311 = vperm.xlu0 %1817, %v2061_v7  }
  0x27   : > { %326 = vperm.xlu1 %1819, %v2040_v2  }
  0x2a   : > { %1820 = vset.pattern.permute.xlu0 %v1937_v8  ;;  %v401_v8 = vsub.s32 2, %v2251_v59 }
  0x2b   : > { %334 = vperm.xlu1 %1819, %v2037_v1   ;;  %330 = vperm.xlu0 %1820, %v2048_v4  }
  0x2f   : > { %338 = vperm.xlu1 %1819, %v2045_v3   ;;  %342 = vperm.xlu0 %1820, %v2056_v6  }
  0x33   : > { %346 = vperm.xlu1 %1819, %v2053_v5   ;;  %350 = vperm.xlu0 %1820, %v2061_v7  }
  0x37   : > { %1821 = vset.pattern.permute.xlu1 %v1938_v9  ;;  %1822 = vset.pattern.permute.xlu0 %v1938_v9 }
  0x38   : > { %372 = vperm.xlu1 %1821, %v2040_v2   ;;  %376 = vperm.xlu0 %1822, %v2048_v4  }
  0x3c   : > { %380 = vperm.xlu1 %1821, %v2037_v1   ;;  %388 = vperm.xlu0 %1822, %v2056_v6  }
  0x40   : > { %384 = vperm.xlu1 %1821, %v2045_v3   ;;  %396 = vperm.xlu0 %1822, %v2061_v7  }
  0x44   : > { %392 = vperm.xlu1 %1821, %v2053_v5   ;;  %1824 = vset.pattern.permute.xlu0 %v1939_v10 }
  0x45   : > { %422 = vperm.xlu0 %1824, %v2048_v4  }
  0x48   : > { %1823 = vset.pattern.permute.xlu1 %v1939_v10 }
  0x49   : > { %418 = vperm.xlu1 %1823, %v2040_v2   ;;  %434 = vperm.xlu0 %1824, %v2056_v6  }
  0x4d   : > { %426 = vperm.xlu1 %1823, %v2037_v1   ;;  %1845 = vset.pattern.permute.xlu0 %v2850_v11 }
  0x4e   : > { %1017 = vperm.xlu0 %1845, %v2037_v1  }
  0x51   : > { %430 = vperm.xlu1 %1823, %v2045_v3  }
  0x52   : > { %1848 = vset.pattern.permute.xlu0 %v2856_v12 }
  0x53   : > { %1055 = vperm.xlu0 %1848, %v2048_v4  }
  0x55   : > { %438 = vperm.xlu1 %1823, %v2053_v5  }
  0x57   : > { %1849 = vset.pattern.permute.xlu0 %v1942_v13 }
  0x58   : > { %761 = vperm.xlu0 %1849, %v2048_v4  }
  0x59   : > { %1825 = vset.pattern.permute.xlu1 %v1942_v13 }
  0x5a   : > { %757 = vperm.xlu1 %1825, %v2040_v2  }
  0x5c   : > { %773 = vperm.xlu0 %1849, %v2056_v6  }
  0x5e   : > { %1826 = vset.pattern.permute.xlu1 %v1943_v14 }
  0x5f   : > { %726 = vperm.xlu1 %1826, %v2048_v4  }
  0x60   : > { %1854 = vset.pattern.permute.xlu0 %v1943_v14 }
  0x61   : > { %722 = vperm.xlu0 %1854, %v2040_v2  }
  0x63   : > { %730 = vperm.xlu1 %1826, %v2037_v1  }
  0x65   : > { %734 = vperm.xlu0 %1854, %v2045_v3  }
  0x67   : > { %1827 = vset.pattern.permute.xlu1 %v1942_v13 }
  0x68   : > { %765 = vperm.xlu1 %1827, %v2037_v1  }
  0x69   : > { %746 = vperm.xlu0 %1854, %v2061_v7  }
  0x6c   : > { %1828 = vset.pattern.permute.xlu1 %v1944_v15 }
  0x6d   : > { %803 = vperm.xlu1 %1828, %v2048_v4   ;;  %1857 = vset.pattern.permute.xlu0 %v1944_v15 }
  0x6e   : > { %799 = vperm.xlu0 %1857, %v2040_v2  }
  0x71   : > { %1829 = vset.pattern.permute.xlu1 %v1945_v16 }
  0x72   : > { %468 = vperm.xlu1 %1829, %v2048_v4   ;;  %807 = vperm.xlu0 %1857, %v2037_v1  }
  0x76   : > { %1830 = vset.pattern.permute.xlu1 %v2867_v17  ;;  %815 = vperm.xlu0 %1857, %v2056_v6  }
  0x77   : > { %841 = vperm.xlu1 %1830, %v2040_v2  }
  0x7a   : > { %819 = vperm.xlu0 %1857, %v2053_v5  }
  0x7b   : > { %845 = vperm.xlu1 %1830, %v2048_v4  }
  0x7e   : > { %1861 = vset.pattern.permute.xlu0 %v1945_v16 }
  0x7f   : > { %1831 = vset.pattern.permute.xlu1 %v2865_v18  ;;  %472 = vperm.xlu0 %1861, %v2037_v1  }
  0x80   : > { %514 = vperm.xlu1 %1831, %v2048_v4  }
  0x83   : > { %484 = vperm.xlu0 %1861, %v2053_v5  }
  0x84   : > { %1832 = vset.pattern.permute.xlu1 %v2863_v19 }
  0x85   : > { %883 = vperm.xlu1 %1832, %v2040_v2  }
  0x87   : > { %1862 = vset.pattern.permute.xlu0 %v2867_v17 }
  0x88   : > { %849 = vperm.xlu0 %1862, %v2037_v1  }
  0x89   : > { %1833 = vset.pattern.permute.xlu1 %v2865_v18 }
  0x8a   : > { %518 = vperm.xlu1 %1833, %v2037_v1  }
  0x8c   : > { %857 = vperm.xlu0 %1862, %v2056_v6  }
  0x8e   : > { %1834 = vset.pattern.permute.xlu1 %v2861_v20 }
  0x8f   : > { %560 = vperm.xlu1 %1834, %v2048_v4  }
  0x90   : > { %861 = vperm.xlu0 %1862, %v2053_v5  }
  0x93   : > { %1835 = vset.pattern.permute.xlu1 %v2863_v19 }
  0x94   : > { %891 = vperm.xlu1 %1835, %v2037_v1   ;;  %1867 = vset.pattern.permute.xlu0 %v2865_v18 }
  0x95   : > { %510 = vperm.xlu0 %1867, %v2040_v2  }
  0x98   : > { %1836 = vset.pattern.permute.xlu1 %v1945_v16 }
  0x99   : > { %v2136_v21 = vpop.permute.xlu1 %291  ;;  %464 = vperm.xlu1 %1836, %v2040_v2   ;;  %530 = vperm.xlu0 %1867, %v2053_v5   ;;  %v2140_v22 = vpop.permute.xlu0 %281 }
  0x9d   : > { %v2142_v23 = vpop.permute.xlu1 %296  ;;  %1837 = vset.pattern.permute.xlu1 %v2861_v20  ;;  %1868 = vset.pattern.permute.xlu0 %v2863_v19  ;;  %v2146_v24 = vpop.permute.xlu0 %286 }
  0x9e   : > { %2868 = vst [vmem:[#allocation3_spill] sm:$0xff] %v2142_v23  ;;  %564 = vperm.xlu1 %1837, %v2037_v1   ;;  %887 = vperm.xlu0 %1868, %v2048_v4  }
  0xa1   : > { %v2150_v25 = vpop.permute.xlu1 %306  ;;  %v2152_v26 = vpop.permute.xlu0 %301 }
  0xa2   : > { %2869 = vst [vmem:[#allocation4_spill] sm:$0xff] %v2152_v26  ;;  %1838 = vset.pattern.permute.xlu1 %v2857_v27  ;;  %899 = vperm.xlu0 %1868, %v2056_v6   ;;  %v2895_v26 = vmov 13  }
  0xa3   : > { %606 = vperm.xlu1 %1838, %v2048_v4  }
  0xa5   : > { %v2157_v28 = vpop.permute.xlu0 %311 }
  0xa6   : > { %2870 = vst [vmem:[#allocation5_spill] sm:$0xff] %v2157_v28  ;;  %v2159_v29 = vpop.permute.xlu1 %326  ;;  %903 = vperm.xlu0 %1868, %v2053_v5  }
  0xa7   : > { %1839 = vset.pattern.permute.xlu1 %v2854_v30 }
  0xa8   : > { %967 = vperm.xlu1 %1839, %v2040_v2  }
  0xaa   : > { %v2164_v31 = vpop.permute.xlu1 %334  ;;  %1873 = vset.pattern.permute.xlu0 %v2861_v20  ;;  %v2167_v32 = vpop.permute.xlu0 %330 }
  0xab   : > { %556 = vperm.xlu0 %1873, %v2040_v2  }
  0xac   : > { %1840 = vset.pattern.permute.xlu1 %v2857_v27 }
  0xad   : > { %610 = vperm.xlu1 %1840, %v2037_v1  }
  0xae   : > { %v2172_v33 = vpop.permute.xlu1 %338  ;;  %v2174_v34 = vpop.permute.xlu0 %342 }
  0xaf   : > { %2871 = vst [vmem:[#allocation6_spill] sm:$0xff] %v2172_v33  ;;  %2872 = vst [vmem:[#allocation7_spill] sm:$0xff] %v2174_v34  ;;  %576 = vperm.xlu0 %1873, %v2053_v5   ;;  %v2892_v34 = vmov 12  }
  0xb1   : > { %1841 = vset.pattern.permute.xlu1 %v2854_v30 }
  0xb2   : > { %971 = vperm.xlu1 %1841, %v2048_v4   ;;  %v2179_v35 = vpop.permute.xlu1 %346  ;;  %v2181_v36 = vpop.permute.xlu0 %350 }
  0xb3   : > { %2873 = vst [vmem:[#allocation8_spill] sm:$0xff] %v2181_v36  ;;  %1874 = vset.pattern.permute.xlu0 %v2859_v37 }
  0xb4   : > { %925 = vperm.xlu0 %1874, %v2040_v2  }
  0xb6   : > { %975 = vperm.xlu1 %1841, %v2037_v1  }
  0xb7   : > { %v2186_v38 = vpop.permute.xlu1 %372  ;;  %v2188_v39 = vpop.permute.xlu0 %376 }
  0xb8   : > { %929 = vperm.xlu0 %1874, %v2048_v4  }
  0xba   : > { %1842 = vset.pattern.permute.xlu1 %v2850_v11 }
  0xbb   : > { %1009 = vperm.xlu1 %1842, %v2040_v2   ;;  %v2193_v40 = vpop.permute.xlu1 %380  ;;  %v2195_v41 = vpop.permute.xlu0 %388 }
  0xbc   : > { %2874 = vst [vmem:[#allocation9_spill] sm:$0xff] %v2195_v41  ;;  %933 = vperm.xlu0 %1874, %v2037_v1  }
  0xbf   : > { %1843 = vset.pattern.permute.xlu1 %v2852_v42  ;;  %v2199_v43 = vpop.permute.xlu1 %384  ;;  %v2201_v44 = vpop.permute.xlu0 %396 }
  0xc0   : > { %2875 = vst [vmem:[#allocation10_spill] sm:$0xff] %v2199_v43  ;;  %2876 = vst [vmem:[#allocation11_spill] sm:$0xff] %v2201_v44  ;;  %656 = vperm.xlu1 %1843, %v2037_v1   ;;  %941 = vperm.xlu0 %1874, %v2056_v6  }
  0xc3   : > { %v2205_v45 = vpop.permute.xlu1 %392 }
  0xc4   : > { %1844 = vset.pattern.permute.xlu1 %v2850_v11  ;;  %945 = vperm.xlu0 %1874, %v2053_v5   ;;  %v2209_v46 = vpop.permute.xlu0 %422 }
  0xc5   : > { %1013 = vperm.xlu1 %1844, %v2048_v4  }
  0xc8   : > { %v2212_v47 = vpop.permute.xlu1 %418  ;;  %1879 = vset.pattern.permute.xlu0 %v2857_v27  ;;  %v2215_v48 = vpop.permute.xlu0 %434 }
  0xc9   : > { %2877 = vst [vmem:[#allocation12_spill] sm:$0xff] %v2215_v48  ;;  %1846 = vset.pattern.permute.xlu1 %v2856_v12  ;;  %622 = vperm.xlu0 %1879, %v2053_v5  }
  0xca   : > { %1051 = vperm.xlu1 %1846, %v2040_v2  }
  0xcc   : > { %v2220_v49 = vpop.permute.xlu1 %426 }
  0xcd   : > { %1882 = vset.pattern.permute.xlu0 %v2854_v30  ;;  %v2223_v50 = vpop.permute.xlu0 %1017 }
  0xce   : > { %1847 = vset.pattern.permute.xlu1 %v2857_v27  ;;  %983 = vperm.xlu0 %1882, %v2056_v6  }
  0xcf   : > { %602 = vperm.xlu1 %1847, %v2040_v2  }
  0xd0   : > { %v2228_v51 = vpop.permute.xlu1 %430 }
  0xd1   : > { %2878 = vst [vmem:[#allocation13_spill] sm:$0xff] %v2228_v51  ;;  %v2890_v51 = vmov 5  }
  0xd2   : > { %987 = vperm.xlu0 %1882, %v2053_v5   ;;  %v2231_v52 = vpop.permute.xlu0 %1055 }
  0xd3   : > { %1850 = vset.pattern.permute.xlu1 %v2856_v12 }
  0xd4   : > { %1059 = vperm.xlu1 %1850, %v2037_v1   ;;  %v2235_v53 = vpop.permute.xlu1 %438  ;;  %v355_v1 = vsub.s32 1, %v2251_v59 }
  0xd6   : > { %1885 = vset.pattern.permute.xlu0 %v2852_v42  ;;  %v2281_v57 = vrot.slane %v2265_v0, %v355_v1 }
  0xd7   : > { %652 = vperm.xlu0 %1885, %v2048_v4   ;;  %v2239_v54 = vpop.permute.xlu0 %761  ;;  %v2272_v4 = vrot.slane %v2265_v0, %v316_v62 }
  0xd8   : > { %1851 = vset.pattern.permute.xlu1 %v2852_v42 }
  0xd9   : > { %648 = vperm.xlu1 %1851, %v2040_v2   ;;  %v758_v55 = vpop.permute.xlu1 %757 }
  0xda   : > { %v784_v62 = vmul.f32 %v758_v55, %v2281_v57 }
  0xdb   : > { %668 = vperm.xlu0 %1885, %v2053_v5   ;;  %v2244_v56 = vpop.permute.xlu0 %773 }
  0xdc   : > { %2879 = vst [vmem:[#allocation14_spill] sm:$0xff] %v2244_v56 }
  0xdd   : > { %1852 = vset.pattern.permute.xlu1 %v1943_v14 }
  0xde   : > { %738 = vperm.xlu1 %1852, %v2056_v6   ;;  %v2248_v58 = vpop.permute.xlu1 %726 }
  0xdf   : > { %1888 = vset.pattern.permute.xlu0 %v2850_v11  ;;  %v2285_v11 = vrot.slane %v2265_v0, %v401_v8 }
  0xe0   : > { %v723_v60 = vpop.permute.xlu0 %722  ;;  %1025 = vperm.xlu0 %1888, %v2056_v6  }
  0xe2   : > { %1853 = vset.pattern.permute.xlu1 %v1942_v13  ;;  %v2255_v61 = vpop.permute.xlu1 %730 }
  0xe3   : > { %769 = vperm.xlu1 %1853, %v2045_v3  }
  0xe4   : > { %v2259_v63 = vpop.permute.xlu0 %734  ;;  %1033 = vperm.xlu0 %1888, %v2061_v7  }
  0xe5   : > { %2880 = vst [vmem:[#allocation15_spill] sm:$0xff] %v2259_v63 }
  0xe7   : > { %1855 = vset.pattern.permute.xlu1 %v1943_v14  ;;  %v2269_v2 = vpop.permute.xlu1 %765  ;;  %v749_v14 = vmul.f32 %v723_v60, %v2272_v4 }
  0xe8   : > { %742 = vperm.xlu1 %1855, %v2053_v5   ;;  %v2276_v9 = vpop.permute.xlu0 %746  ;;  %1892 = vset.pattern.permute.xlu0 %v2856_v12 }
  0xe9   : > { %2881 = vst [vmem:[#allocation16_spill] sm:$0xff] %v2276_v9  ;;  %1067 = vperm.xlu0 %1892, %v2056_v6   ;;  %v791_v12 = vadd.f32 %v784_v62, %v749_v14  ;;  %v447_v9 = vsub.s32 3, %v2251_v59 }
  0xeb   : > { %v2378_v56 = vrot.slane %v2265_v0, %v447_v9  ;;  %v785_v9 = vmul.f32 %v2239_v54, %v2281_v57 }
  0xec   : > { %1856 = vset.pattern.permute.xlu1 %v1942_v13  ;;  %v2289_v42 = vpop.permute.xlu1 %803 }
  0xed   : > { %777 = vperm.xlu1 %1856, %v2053_v5   ;;  %v800_v30 = vpop.permute.xlu0 %799 }
  0xee   : > { %v826_v27 = vmul.f32 %v800_v30, %v2285_v11 }
  0xf0   : > { %v2293_v37 = vadd.f32 %v826_v27, %v791_v12 }
  0xf1   : > { %781 = vperm.xlu1 %1856, %v2061_v7   ;;  %v2296_v60 = vpop.permute.xlu1 %468  ;;  %v2298_v1 = vpop.permute.xlu0 %807 }
  0xf5   : > { %1858 = vset.pattern.permute.xlu1 %v1944_v15  ;;  %v2301_v55 = vpop.permute.xlu0 %815 }
  0xf6   : > { %2882 = vst [vmem:[#allocation17_spill] sm:$0xff] %v2301_v55  ;;  %811 = vperm.xlu1 %1858, %v2045_v3   ;;  %v2304_v13 = vpop.permute.xlu1 %841  ;;  %v405_v55 = vmul.f32 %v2285_v11, %v2193_v40  ;;  %v828_v40 = vmul.f32 %v2298_v1, %v2285_v11 }
  0xf9   : > { %v2306_v5 = vpop.permute.xlu0 %819 }
  0xfa   : > { %2883 = vst [vmem:[#allocation18_spill] sm:$0xff] %v2306_v5  ;;  %1859 = vset.pattern.permute.xlu1 %v1939_v10  ;;  %v2309_v12 = vpop.permute.xlu1 %845  ;;  %v493_v5 = vsub.s32 4, %v2251_v59 }
  0xfb   : > { %442 = vperm.xlu1 %1859, %v2061_v7  }
  0xfe   : > { %v2312_v27 = vpop.permute.xlu0 %472 }
  0xff   : > { %1860 = vset.pattern.permute.xlu1 %v1945_v16  ;;  %v2315_v30 = vpop.permute.xlu1 %514 }
 0x100   : > { %2884 = vst [vmem:[#allocation19_spill] sm:$0xff] %v2315_v30  ;;  %476 = vperm.xlu1 %1860, %v2045_v3  }
 0x102   : > { %v2318_v8 = vpop.permute.xlu0 %484 }
 0x103   : > { %2885 = vst [vmem:[#allocation20_spill] sm:$0xff] %v2318_v8 }
 0x104   : > { %480 = vperm.xlu1 %1860, %v2056_v6   ;;  %v2321_v14 = vpop.permute.xlu1 %883 }
 0x107   : > { %v850_v62 = vpop.permute.xlu0 %849 }
 0x108   : > { %1863 = vset.pattern.permute.xlu1 %v1944_v15  ;;  %v870_v1 = vmul.f32 %v850_v62, %v2378_v56 }
 0x109   : > { %823 = vperm.xlu1 %1863, %v2061_v7   ;;  %v2325_v10 = vpop.permute.xlu1 %518 }
 0x10b   : > { %v2327_v20 = vpop.permute.xlu0 %857 }
 0x10c   : > { %2886 = vst [vmem:[#allocation21_spill] sm:$0xff] %v2327_v20  ;;  %v320_v20 = vmul.f32 %v2272_v4, %v2136_v21  ;;  %v751_v21 = vmul.f32 %v2255_v61, %v2272_v4 }
 0x10d   : > { %1864 = vset.pattern.permute.xlu1 %v2867_v17 }
 0x10e   : > { %853 = vperm.xlu1 %1864, %v2045_v3   ;;  %v2331_v19 = vpop.permute.xlu1 %560 }
 0x10f   : > { %2887 = vst [vmem:[#allocation22_spill] sm:$0xff] %v2331_v19  ;;  %v2333_v18 = vpop.permute.xlu0 %861 }
 0x110   : > { %2888 = vst [vmem:[#allocation23_spill] sm:$0xff] %v2333_v18 }
 0x112   : > { %1865 = vset.pattern.permute.xlu1 %v1945_v16 }
 0x113   : > { %488 = vperm.xlu1 %1865, %v2061_v7   ;;  %v892_v48 = vpop.permute.xlu1 %891 }
 0x114   : > { %v2337_v15 = vpop.permute.xlu0 %510 }
 0x115   : > { %2889 = vst [vmem:[#allocation24_spill] sm:$0xff] %v2337_v15  ;;  %v451_v15 = vmul.f32 %v2378_v56, %v2220_v49 }
 0x117   : > { %1866 = vset.pattern.permute.xlu1 %v2890_v51 }
 0x118   : > { %522 = vperm.xlu1 %1866, %v2045_v3   ;;  %v2341_v41 = vpop.permute.xlu1 %464  ;;  %v2343_v17 = vpop.permute.xlu0 %530 }
 0x119   : > { %2891 = vst [vmem:[#allocation25_spill] sm:$0xff] %v2343_v17 }
 0x11c   : > { %526 = vperm.xlu1 %1866, %v2056_v6  }
 0x11d   : > { %v565_v43 = vpop.permute.xlu1 %564  ;;  %v888_v23 = vpop.permute.xlu0 %887 }
 0x120   : > { %1869 = vset.pattern.permute.xlu1 %v2892_v34 }
 0x121   : > { %865 = vperm.xlu1 %1869, %v2061_v7   ;;  %v2348_v16 = vpop.permute.xlu0 %899 }
 0x122   : > { %2893 = vst [vmem:[#allocation26_spill] sm:$0xff] %v2348_v16  ;;  %v2350_v33 = vpop.permute.xlu1 %606  ;;  %v2899_v16 = vmov 6  }
 0x123   : > { %2894 = vst [vmem:[#allocation27_spill] sm:$0xff] %v2350_v33 }
 0x125   : > { %1870 = vset.pattern.permute.xlu1 %v2895_v26  ;;  %v2353_v44 = vpop.permute.xlu0 %903 }
 0x126   : > { %2896 = vst [vmem:[#allocation28_spill] sm:$0xff] %v2353_v44  ;;  %895 = vperm.xlu1 %1870, %v2045_v3   ;;  %v359_v44 = vmul.f32 %v2281_v57, %v2164_v31  ;;  %v2383_v31 = vrot.slane %v2265_v0, %v493_v5  ;;  %v750_v5 = vmul.f32 %v2248_v58, %v2272_v4 }
 0x127   : > { %v2356_v36 = vpop.permute.xlu1 %967 }
 0x128   : > { %v366_v17 = vadd.f32 %v359_v44, %v320_v20  ;;  %v497_v61 = vmul.f32 %v2383_v31, %v2312_v27 }
 0x12a   : > { %1871 = vset.pattern.permute.xlu1 %v2890_v51  ;;  %v2359_v28 = vpop.permute.xlu0 %556  ;;  %v539_v51 = vsub.s32 5, %v2251_v59  ;;  %v412_v49 = vadd.f32 %v405_v55, %v366_v17  ;;  %v912_v17 = vmul.f32 %v892_v48, %v2383_v31  ;;  %v869_v55 = vmul.f32 %v2309_v12, %v2378_v56 }
 0x12b   : > { %2897 = vst [vmem:[#allocation29_spill] sm:$0xff] %v2359_v28  ;;  %534 = vperm.xlu1 %1871, %v2061_v7   ;;  %v585_v28 = vsub.s32 6, %v2251_v59  ;;  %v868_v48 = vmul.f32 %v2304_v13, %v2378_v56 }
 0x12c   : > { %v611_v34 = vpop.permute.xlu1 %610  ;;  %v2399_v20 = vrot.slane %v2265_v0, %v539_v51  ;;  %v458_v30 = vadd.f32 %v451_v15, %v412_v49 }
 0x12d   : > { %v2407_v8 = vrot.slane %v2265_v0, %v585_v28 }
 0x12e   : > { %v2363_v18 = vpop.permute.xlu0 %576  ;;  %v543_v51 = vmul.f32 %v2399_v20, %v2325_v10  ;;  %v504_v28 = vadd.f32 %v497_v61, %v458_v30  ;;  %v358_v61 = vmul.f32 %v2281_v57, %v2167_v32 }
 0x12f   : > { %2898 = vst [vmem:[#allocation30_spill] sm:$0xff] %v2363_v18  ;;  %1872 = vset.pattern.permute.xlu1 %v2899_v16  ;;  %v786_v18 = vmul.f32 %v2269_v2, %v2281_v57  ;;  %v631_v2 = vsub.s32 7, %v2251_v59  ;;  %v827_v59 = vmul.f32 %v2289_v42, %v2285_v11 }
 0x130   : > { %568 = vperm.xlu1 %1872, %v2045_v3  }
 0x131   : > { %v2371_v63 = vpop.permute.xlu1 %971  ;;  %v793_v19 = vadd.f32 %v786_v18, %v751_v21  ;;  %v792_v18 = vadd.f32 %v785_v9, %v750_v5  ;;  %v2417_v42 = vrot.slane %v2265_v0, %v631_v2  ;;  %v550_v21 = vadd.f32 %v543_v51, %v504_v28 }
 0x132   : > { %v2900_v2 = vmov 14   ;;  %v318_v28 = vmul.f32 %v2272_v4, %v2140_v22 }
 0x133   : > { %v926_v33 = vpop.permute.xlu0 %925  ;;  %v835_v58 = vadd.f32 %v828_v40, %v793_v19  ;;  %v589_v19 = vmul.f32 %v2407_v8, %v565_v43  ;;  %v834_v15 = vadd.f32 %v827_v59, %v792_v18  ;;  %v635_v12 = vmul.f32 %v2417_v42, %v611_v34  ;;  %v2430_v43 = vld [vmem:[%s2845_s1 + $0x8] ss:$0 sm:$0xff] }
 0x134   : > { %572 = vperm.xlu1 %1872, %v2056_v6   ;;  %v1038_v0 = vmul.f32 %v2223_v50, %v2417_v42  ;;  %v319_v50 = vmul.f32 %v2272_v4, %v2146_v24  ;;  %v2450_v24 = vld [vmem:[%s2846_s2] ss:$0 sm:$0xff] }
 0x135   : > { %v976_v44 = vpop.permute.xlu1 %975  ;;  %v877_v27 = vadd.f32 %v870_v1, %v835_v58  ;;  %v876_v30 = vadd.f32 %v869_v55, %v834_v15  ;;  %v596_v5 = vadd.f32 %v589_v19, %v550_v21  ;;  %v875_v1 = vadd.f32 %v868_v48, %v2293_v37 }
 0x136   : > { %v996_v34 = vmul.f32 %v976_v44, %v2407_v8  ;;  %v365_v19 = vadd.f32 %v358_v61, %v319_v50  ;;  %v404_v15 = vmul.f32 %v2285_v11, %v2188_v39 }
 0x137   : > { %v930_v54 = vpop.permute.xlu0 %929  ;;  %v919_v40 = vadd.f32 %v912_v17, %v877_v27  ;;  %v642_v51 = vadd.f32 %v635_v12, %v596_v5 }
 0x138   : > { %1875 = vset.pattern.permute.xlu1 %v2895_v26  ;;  %v911_v26 = vmul.f32 %v888_v23, %v2383_v31  ;;  %v953_v13 = vmul.f32 %v930_v54, %v2399_v20  ;;  %v910_v23 = vmul.f32 %v2321_v14, %v2383_v31  ;;  %v952_v14 = vmul.f32 %v926_v33, %v2399_v20 }
 0x139   : > { %907 = vperm.xlu1 %1875, %v2061_v7   ;;  %v995_v33 = vmul.f32 %v2371_v63, %v2407_v8  ;;  %v357_v63 = vmul.f32 %v2281_v57, %v2159_v29  ;;  %v450_v29 = vmul.f32 %v2378_v56, %v2209_v46  ;;  %v408_v46 = vmul.f32 %v2285_v11, %v2205_v45 }
 0x13a   : > { %v1010_v62 = vpop.permute.xlu1 %1009  ;;  %v918_v59 = vadd.f32 %v911_v26, %v876_v30  ;;  %v917_v55 = vadd.f32 %v910_v23, %v875_v1  ;;  %v403_v30 = vmul.f32 %v2285_v11, %v2186_v38  ;;  %v449_v38 = vmul.f32 %v2378_v56, %v2212_v47 }
 0x13b   : > { %v934_v10 = vpop.permute.xlu0 %933  ;;  %v1036_v12 = vmul.f32 %v1010_v62, %v2417_v42  ;;  %v364_v62 = vadd.f32 %v357_v63, %v318_v28  ;;  %v323_v1 = vmul.f32 %v2272_v4, %v2150_v25  ;;  %v454_v25 = vmul.f32 %v2378_v56, %v2235_v53  ;;  %v2906_v63 = vld [vmem:[#allocation25_spill] sm:$0xff] }
 0x13c   : > { %v954_v9 = vmul.f32 %v934_v10, %v2399_v20  ;;  %v960_v18 = vadd.f32 %v953_v13, %v918_v59  ;;  %v959_v48 = vadd.f32 %v952_v14, %v917_v55  ;;  %v1079_v10 = vmul.f32 %v2430_v43, %v2231_v52 }
 0x13d   : > { %1876 = vset.pattern.permute.xlu1 %v2900_v2  ;;  %v411_v13 = vadd.f32 %v404_v15, %v365_v19  ;;  %v410_v59 = vadd.f32 %v403_v30, %v364_v62  ;;  %v495_v14 = vmul.f32 %v2383_v31, %v2341_v41  ;;  %v2909_v62 = vld [vmem:[#allocation30_spill] sm:$0xff] }
 0x13e   : > { %v961_v49 = vadd.f32 %v954_v9, %v919_v40  ;;  %937 = vperm.xlu1 %1876, %v2045_v3   ;;  %v1002_v21 = vadd.f32 %v995_v33, %v960_v18  ;;  %v994_v40 = vmul.f32 %v2356_v36, %v2407_v8  ;;  %v2903_v33 = vld [vmem:[#allocation20_spill] sm:$0xff] }
 0x13f   : > { %v657_v54 = vpop.permute.xlu1 %656  ;;  %v2443_v58 = vpop.permute.xlu0 %941  ;;  %v456_v55 = vadd.f32 %v449_v38, %v410_v59  ;;  %v500_v41 = vmul.f32 %v2383_v31, %v2903_v33 }
 0x140   : > { %v1003_v17 = vadd.f32 %v996_v34, %v961_v49  ;;  %v681_v44 = vmul.f32 %v2430_v43, %v657_v54  ;;  %v1001_v52 = vadd.f32 %v994_v40, %v959_v48  ;;  %v362_v34 = vmul.f32 %v2281_v57, %v2179_v35  ;;  %v2904_v48 = vld [vmem:[#allocation22_spill] sm:$0xff] }
 0x141   : > { %v496_v35 = vmul.f32 %v2383_v31, %v2296_v60  ;;  %v588_v53 = vmul.f32 %v2407_v8, %v2904_v48  ;;  %v546_v40 = vmul.f32 %v2399_v20, %v2906_v63 }
 0x142   : > { %v688_v32 = vadd.f32 %v681_v44, %v642_v51  ;;  %1877 = vset.pattern.permute.xlu1 %v2899_v16  ;;  %v2453_v37 = vadd.f32 %v1038_v0, %v1003_v17  ;;  %v2901_v0 = vmov 7   ;;  %v1043_v49 = vadd.f32 %v1036_v12, %v1001_v52 }
 0x143   : > { %580 = vperm.xlu1 %1877, %v2061_v7   ;;  %v2460_v27 = vpop.permute.xlu0 %945  ;;  %v457_v51 = vadd.f32 %v450_v29, %v411_v13  ;;  %v369_v44 = vadd.f32 %v362_v34, %v323_v1  ;;  %v592_v34 = vmul.f32 %v2407_v8, %v2909_v62 }
 0x144   : > { %v701_v26 = vadd.f32 %v2450_v24, %v688_v32  ;;  %v1014_v16 = vpop.permute.xlu1 %1013  ;;  %v2902_v32 = vld [vmem:[#allocation19_spill] sm:$0xff] }
 0x145   : > { %v1037_v22 = vmul.f32 %v1014_v16, %v2417_v42  ;;  %v542_v28 = vmul.f32 %v2399_v20, %v2902_v32  ;;  %v415_v60 = vadd.f32 %v408_v46, %v369_v44  ;;  %v503_v15 = vadd.f32 %v496_v35, %v457_v51 }
 0x146   : > { %v708_v39 = vmax.f32 %v701_v26, 0.0  ;;  %v2905_v26 = vld [vmem:[#allocation24_spill] sm:$0xff] }
 0x147   : > { %v1044_v9 = vadd.f32 %v1037_v22, %v1002_v21  ;;  %1878 = vset.pattern.permute.xlu1 %v2901_v0  ;;  %v541_v16 = vmul.f32 %v2399_v20, %v2905_v26  ;;  %v461_v22 = vadd.f32 %v454_v25, %v415_v60  ;;  %v549_v12 = vadd.f32 %v542_v28, %v503_v15  ;;  %v2911_v60 = vld [vmem:[#allocation14_spill] sm:$0xff] }
 0x148   : > { %716 = vst.msk [vmem:[#allocation2 + $0x10] sm:$0x1f] %vm713_vm0, %v708_v39  ;;  %614 = vperm.xlu1 %1878, %v2045_v3   ;;  %v623_v36 = vpop.permute.xlu0 %622  ;;  %v788_v33 = vmul.f32 %v2911_v60, %v2281_v57 }
 0x149   : > { %v1086_v23 = vadd.f32 %v1079_v10, %v1044_v9  ;;  %v1052_v5 = vpop.permute.xlu1 %1051  ;;  %v502_v10 = vadd.f32 %v495_v14, %v456_v55  ;;  %v2908_v9 = vld [vmem:[#allocation29_spill] sm:$0xff]  ;;  %v507_v13 = vadd.f32 %v500_v41, %v461_v22  ;;  %v2913_v22 = vmov 8  }
 0x14a   : > { %v1078_v50 = vmul.f32 %v2430_v43, %v1052_v5  ;;  %v587_v30 = vmul.f32 %v2407_v8, %v2908_v9 }
 0x14b   : > { %v1093_v61 = vadd.f32 %v2450_v24, %v1086_v23  ;;  %v595_v23 = vadd.f32 %v588_v53, %v549_v12  ;;  %v548_v5 = vadd.f32 %v541_v16, %v502_v10  ;;  %v553_v38 = vadd.f32 %v546_v40, %v507_v13  ;;  %v2914_v40 = vld [vmem:[#allocation21_spill] sm:$0xff] }
 0x14c   : > { %v1085_v54 = vadd.f32 %v1078_v50, %v1043_v49  ;;  %618 = vperm.xlu1 %1878, %v2056_v6   ;;  %v2910_v50 = vmov 15   ;;  %v872_v12 = vmul.f32 %v2914_v40, %v2378_v56 }
 0x14d   : > { %v1100_v47 = vmax.f32 %v1093_v61, 0.0  ;;  %v2495_v17 = vpop.permute.xlu0 %983  ;;  %v594_v46 = vadd.f32 %v587_v30, %v548_v5 }
 0x14e   : > { %v1092_v18 = vadd.f32 %v2450_v24, %v1085_v54  ;;  %v603_v45 = vpop.permute.xlu1 %602  ;;  %v638_v54 = vmul.f32 %v2417_v42, %v623_v36 }
 0x14f   : > { %1108 = vst.msk [vmem:[#allocation2 + $0x40] sm:$0x1f] %vm713_vm0, %v1100_v47  ;;  %v633_v49 = vmul.f32 %v2417_v42, %v603_v45  ;;  %v599_v47 = vadd.f32 %v592_v34, %v553_v38  ;;  %v956_v34 = vmul.f32 %v2443_v58, %v2399_v20 }
 0x150   : > { %v1099_v19 = vmax.f32 %v1092_v18, 0.0  ;;  %1880 = vset.pattern.permute.xlu1 %v2900_v2  ;;  %v2907_v2 = vld [vmem:[#allocation27_spill] sm:$0xff] }
 0x151   : > { %949 = vperm.xlu1 %1880, %v2061_v7   ;;  %v2511_v21 = vpop.permute.xlu0 %987  ;;  %v634_v39 = vmul.f32 %v2417_v42, %v2907_v2  ;;  %v640_v44 = vadd.f32 %v633_v49, %v594_v46  ;;  %v645_v55 = vadd.f32 %v638_v54, %v599_v47 }
 0x152   : > { %1107 = vst.msk [vmem:[#allocation2 + $0x38] sm:$0x1f] %vm713_vm0, %v1099_v19  ;;  %v999_v40 = vmul.f32 %v2511_v21, %v2407_v8  ;;  %v269_v21 = vld [vmem:[%s2847_s3] sm:$0xff] }
 0x153   : > { %v1060_v52 = vpop.permute.xlu1 %1059  ;;  %v641_v59 = vadd.f32 %v634_v39, %v595_v23  ;;  %v2915_v39 = vld [vmem:[#allocation15_spill] sm:$0xff] }
 0x154   : > { %v1080_v29 = vmul.f32 %v2430_v43, %v1060_v52  ;;  %v752_v9 = vmul.f32 %v2915_v39, %v2272_v4  ;;  %v2916_v52 = vld [vmem:[#allocation26_spill] sm:$0xff] }
 0x155   : > { %1881 = vset.pattern.permute.xlu1 %v2910_v50  ;;  %v914_v13 = vmul.f32 %v2916_v52, %v2383_v31  ;;  %v2922_v52 = vmov 17  }
 0x156   : > { %v1087_v61 = vadd.f32 %v1080_v29, %v2453_v37  ;;  %979 = vperm.xlu1 %1881, %v2045_v3   ;;  %v653_v1 = vpop.permute.xlu0 %652 }
 0x157   : > { %v680_v51 = vmul.f32 %v2430_v43, %v653_v1 }
 0x158   : > { %v1094_v35 = vadd.f32 %v2450_v24, %v1087_v61  ;;  %v649_v14 = vpop.permute.xlu1 %648  ;;  %v998_v61 = vmul.f32 %v2495_v17, %v2407_v8 }
 0x159   : > { %v687_v25 = vadd.f32 %v680_v51, %v641_v59  ;;  %v679_v18 = vmul.f32 %v2430_v43, %v649_v14 }
 0x15a   : > { %v1101_v45 = vmax.f32 %v1094_v35, 0.0  ;;  %1883 = vset.pattern.permute.xlu1 %v2901_v0  ;;  %v669_v37 = vpop.permute.xlu0 %668  ;;  %v2912_v0 = vld [vmem:[#allocation17_spill] sm:$0xff] }
 0x15b   : > { %v700_v32 = vadd.f32 %v2450_v24, %v687_v25  ;;  %v686_v28 = vadd.f32 %v679_v18, %v640_v44  ;;  %v684_v36 = vmul.f32 %v2430_v43, %v669_v37  ;;  %626 = vperm.xlu1 %1883, %v2061_v7   ;;  %v830_v53 = vmul.f32 %v2912_v0, %v2285_v11  ;;  %v2917_v44 = vld [vmem:[#allocation18_spill] sm:$0xff] }
 0x15c   : > { %1109 = vst.msk [vmem:[#allocation2 + $0x48] sm:$0x1f] %vm713_vm0, %v1101_v45  ;;  %v831_v25 = vmul.f32 %v2917_v44, %v2285_v11 }
 0x15d   : > { %v707_v41 = vmax.f32 %v700_v32, 0.0  ;;  %v699_v19 = vadd.f32 %v2450_v24, %v686_v28  ;;  %v691_v15 = vadd.f32 %v684_v36, %v645_v55  ;;  %v739_v48 = vpop.permute.xlu1 %738  ;;  %v2919_v32 = vld [vmem:[#allocation23_spill] sm:$0xff] }
 0x15e   : > { %v753_v26 = vmul.f32 %v739_v48, %v2272_v4  ;;  %v873_v28 = vmul.f32 %v2919_v32, %v2378_v56 }
 0x15f   : > { %715 = vst.msk [vmem:[#allocation2 + $0x8] sm:$0x1f] %vm713_vm0, %v707_v41  ;;  %v706_v16 = vmax.f32 %v699_v19, 0.0  ;;  %v704_v10 = vadd.f32 %v2450_v24, %v691_v15  ;;  %1884 = vset.pattern.permute.xlu1 %v2913_v22  ;;  %v1026_v63 = vpop.permute.xlu0 %1025  ;;  %v2920_v41 = vld [vmem:[#allocation16_spill] sm:$0xff] }
 0x160   : > { %v795_v2 = vadd.f32 %v788_v33, %v753_v26  ;;  %660 = vperm.xlu1 %1884, %v2045_v3   ;;  %v1040_v51 = vmul.f32 %v1026_v63, %v2417_v42  ;;  %v755_v19 = vmul.f32 %v2920_v41, %v2272_v4  ;;  %v2921_v15 = vld [vmem:[#allocation28_spill] sm:$0xff] }
 0x161   : > { %714 = vst.msk [vmem:[#allocation2] sm:$0x1f] %vm713_vm0, %v706_v16  ;;  %v711_v30 = vmax.f32 %v704_v10, 0.0  ;;  %v915_v48 = vmul.f32 %v2921_v15, %v2383_v31  ;;  %v957_v16 = vmul.f32 %v2460_v27, %v2399_v20 }
 0x162   : > { %v837_v29 = vadd.f32 %v830_v53, %v795_v2  ;;  %v770_v23 = vpop.permute.xlu1 %769 }
 0x163   : > { %719 = vst.msk [vmem:[#allocation2 + $0x28] sm:$0x1f] %vm713_vm0, %v711_v30  ;;  %v787_v5 = vmul.f32 %v770_v23, %v2281_v57  ;;  %v2555_v62 = vpop.permute.xlu0 %1033  ;;  %v2574_v55 = vld [vmem:[#allocation2 + $0x48] sm:$0xf] }
 0x164   : > { %v879_v49 = vadd.f32 %v872_v12, %v837_v29  ;;  %664 = vperm.xlu1 %1884, %v2056_v6   ;;  %v1119_v6 = vld [vmem:[#allocation2 + $0x38] sm:$0xf]  ;;  %v270_v23 = vld [vmem:[%s2847_s3 + $0x8] sm:$0xff] }
 0x165   : > { %v794_v38 = vadd.f32 %v787_v5, %v752_v9  ;;  %v1893_v9 = vld [vmem:[%s2034_s6 + $0x28] sm:$0x1f] }
 0x166   : > { %v921_v1 = vadd.f32 %v914_v13, %v879_v49  ;;  %v1116_v59 = vld [vmem:[#allocation2 + $0x8] sm:$0xf]  ;;  %v1894_v13 = vld [vmem:[%s2034_s6 + $0x18] sm:$0x1f]  ;;  %v1958_v49 = vmov 0.0|0.0  }
 0x167   : > { %v743_v46 = vpop.permute.xlu1 %742  ;;  %1128 = vrot.lane.b32.xlu0 %v1116_v59, %s1954_s13  ;;  %v1125_v26 = vld [vmem:[#allocation2 + $0x9] sm:$0xf]  ;;  %1710 = vmatprep.subr.bf16.mxu0 %v1958_v49 }
 0x168   : > { %v963_v54 = vadd.f32 %v956_v34, %v921_v1  ;;  %1886 = vset.pattern.permute.xlu1 %v2910_v50  ;;  %v1068_v35 = vpop.permute.xlu0 %1067  ;;  %v754_v18 = vmul.f32 %v743_v46, %v2272_v4  ;;  %v2918_v50 = vmov 16   ;;  %v2611_v34 = vpack.c.bf16 %v270_v23, %v269_v21  ;;  %1722 = vmatprep.subr.bf16.mxu1 %v1958_v49  ;;  %v272_v1 = vld [vmem:[%s2847_s3 + $0x18] sm:$0xff]  ;;  %v1124_v15 = vld [vmem:[#allocation2 + $0x1] sm:$0xf] }
 0x169   : > { %991 = vperm.xlu1 %1886, %v2061_v7   ;;  %v1082_v14 = vmul.f32 %v2430_v43, %v1068_v35 }
 0x16a   : > { %v1005_v58 = vadd.f32 %v998_v61, %v963_v54  ;;  %1712 = vmatpush3.bf16.msra.mxu0 %v2611_v34  ;;  %v271_v61 = vld [vmem:[%s2847_s3 + $0x10] sm:$0xff]  ;;  %1724 = vmatpush3.bf16.msra.mxu1 %v2611_v34 }
 0x16b   : > { %1136 = vrot.lane.b32.xlu0 %v1119_v6, %s1955_s14  ;;  %1713 = vmatprep.subr.bf16.mxu0 %v1958_v49  ;;  %v2625_v59 = vpack.c.bf16 %v272_v1, %v271_v61  ;;  %v2628_v54 = vld [vmem:[#allocation2 + $0x10] sm:$0xf] }
 0x16c   : > { %v1047_v17 = vadd.f32 %v1040_v51, %v1005_v58  ;;  %v778_v47 = vpop.permute.xlu1 %777  ;;  %1725 = vmatprep.subr.bf16.mxu1 %v1958_v49  ;;  %v2923_v51 = vld [vmem:[#allocation5_spill] sm:$0xff]  ;;  %v2924_v58 = vld [vmem:[#allocation8_spill] sm:$0xff] }
 0x16d   : > { %v789_v45 = vmul.f32 %v778_v47, %v2281_v57  ;;  %1887 = vset.pattern.permute.xlu1 %v2918_v50  ;;  %v324_v35 = vmul.f32 %v2272_v4, %v2923_v51  ;;  %v363_v6 = vmul.f32 %v2281_v57, %v2924_v58  ;;  %v274_v47 = vld [vmem:[%s2847_s3 + $0x28] sm:$0xff]  ;;  %v2926_v51 = vld [vmem:[#allocation4_spill] sm:$0xff] }
 0x16e   : > { %v1089_v37 = vadd.f32 %v1082_v14, %v1047_v17  ;;  %1021 = vperm.xlu1 %1887, %v2045_v3   ;;  %1715 = vmatpush3.bf16.msra.mxu0 %v2625_v59  ;;  %v273_v17 = vld [vmem:[%s2847_s3 + $0x20] sm:$0xff]  ;;  %v2927_v58 = vld [vmem:[#allocation6_spill] sm:$0xff] }
 0x16f   : > { %v796_v36 = vadd.f32 %v789_v45, %v754_v18  ;;  %1144 = vrot.lane.b32.xlu0 %v2574_v55, %s1956_s15  ;;  %1716 = vmatprep.subr.bf16.mxu0 %v1958_v49  ;;  %v1121_v18 = vld [vmem:[#allocation2 + $0x40] sm:$0xf]  ;;  %v370_v45 = vadd.f32 %v363_v6, %v324_v35  ;;  %v322_v35 = vmul.f32 %v2272_v4, %v2926_v51 }
 0x170   : > { %v1096_v60 = vadd.f32 %v2450_v24, %v1089_v37  ;;  %v782_v33 = vpop.permute.xlu1 %781  ;;  %1727 = vmatpush3.bf16.msra.mxu1 %v2625_v59  ;;  %v360_v6 = vmul.f32 %v2281_v57, %v2927_v58 }
 0x171   : > { %v838_v3 = vadd.f32 %v831_v25, %v796_v36  ;;  %v790_v0 = vmul.f32 %v782_v33, %v2281_v57  ;;  %v2646_v25 = vpack.c.bf16 %v274_v47, %v273_v17  ;;  %1728 = vmatprep.subr.bf16.mxu1 %v1958_v49  ;;  %v275_v36 = vld [vmem:[%s2847_s3 + $0x30] sm:$0xff] }
 0x172   : > { %v1103_v53 = vmax.f32 %v1096_v60, 0.0  ;;  %1889 = vset.pattern.permute.xlu1 %v2913_v22  ;;  %v276_v60 = vld [vmem:[%s2847_s3 + $0x38] sm:$0xff] }
 0x173   : > { %v880_v10 = vadd.f32 %v873_v28, %v838_v3  ;;  %v797_v63 = vadd.f32 %v790_v0, %v755_v19  ;;  %672 = vperm.xlu1 %1889, %v2061_v7   ;;  %1152 = vrot.lane.b32.xlu0 %v1125_v26, %s1957_s16  ;;  %v2663_v41 = vpack.c.bf16 %v276_v60, %v275_v36  ;;  %v1962_v0 = vmov 0.0   ;;  %v2932_v60 = vld [vmem:[#allocation13_spill] sm:$0xff] }
 0x174   : > { %1111 = vst.msk [vmem:[#allocation2 + $0x58] sm:$0x1f] %vm713_vm0, %v1103_v53  ;;  %1718 = vmatpush3.bf16.msra.mxu0 %v2646_v25  ;;  %1730 = vmatpush3.bf16.msra.mxu1 %v2646_v25 }
 0x175   : > { %v812_v12 = vpop.permute.xlu1 %811  ;;  %v922_v22 = vadd.f32 %v915_v48, %v880_v10  ;;  %1719 = vmatprep.subr.bf16.mxu0 %v1958_v49  ;;  %1731 = vmatprep.subr.bf16.mxu1 %v1958_v49  ;;  %v2677_v10 = vld [vmem:[%s2847_s3 + $0x40] sm:$0xff] }
 0x176   : > { %v829_v2 = vmul.f32 %v812_v12, %v2285_v11  ;;  %1665 = vmatprep.mubr.msk.f32.mxu0 %vm1964_vm1, %v1962_v0  ;;  %1686 = vmatprep.mubr.msk.f32.mxu1 %vm1964_vm1, %v1962_v0 }
 0x177   : > { %1890 = vset.pattern.permute.xlu1 %v2918_v50  ;;  %v964_v27 = vadd.f32 %v957_v16, %v922_v22  ;;  %v2925_v50 = vld [vmem:[#allocation11_spill] sm:$0xff] }
 0x178   : > { %v836_v39 = vadd.f32 %v829_v2, %v794_v38  ;;  %1029 = vperm.xlu1 %1890, %v1893_v9   ;;  %v1895_v38 = vld [vmem:[%s2034_s6 + $0x30] sm:$0x1f]  ;;  %s1959_s6 = smov 16   ;;  %v409_v37 = vmul.f32 %v2285_v11, %v2925_v50  ;;  %1721 = vmatpush3.bf16.msra.mxu0 %v2663_v41 }
 0x179   : > { %v2597_v7 = vadd.f32 %v999_v40, %v964_v27  ;;  %1663 = vmatprep.subr.mxu0 %v1962_v0  ;;  %1733 = vmatpush3.bf16.msra.mxu1 %v2663_v41  ;;  %v2672_v16 = vld [vmem:[#allocation2 + $0x11] sm:$0xf] }
 0x17a   : > { %v443_v30 = vpop.permute.xlu1 %442  ;;  %v416_v48 = vadd.f32 %v409_v37, %v370_v45  ;;  %1684 = vmatprep.subr.mxu1 %v1962_v0  ;;  %v2930_v45 = vld [vmem:[#allocation10_spill] sm:$0xff] }
 0x17b   : > { %v455_v33 = vmul.f32 %v2378_v56, %v443_v30  ;;  %v406_v50 = vmul.f32 %v2285_v11, %v2930_v45 }
 0x17c   : > { %1891 = vset.pattern.permute.xlu1 %v2922_v52  ;;  %1664 = vmatpush3.msra.mxu0 %v2677_v10 }
 0x17d   : > { %1063 = vperm.xlu1 %1891, %v1894_v13   ;;  %v462_v53 = vadd.f32 %v455_v33, %v416_v48  ;;  %1734 = vmatprep.subr.bf16.mxu0 %v1958_v49  ;;  %v452_v33 = vmul.f32 %v2378_v56, %v2932_v60 }
 0x17e   : > { %1685 = vmatpush3.msra.mxu1 %v2677_v10 }
 0x17f   : > { %v2601_v29 = vpop.permute.xlu1 %476 }
 0x181   : > { %1071 = vperm.xlu1 %1891, %v1893_v9  }
 0x183   : > { %v2609_v5 = vpop.permute.xlu1 %480 }
 0x185   : > { %1075 = vperm.xlu1 %1891, %v1895_v38  }
 0x188   : > { %v824_v46 = vpop.permute.xlu1 %823 }
 0x189   : > { %v832_v14 = vmul.f32 %v824_v46, %v2285_v11  ;;  %1132 = vrot.lane.b32.xlu1 %v2628_v54, %s1959_s6 }
 0x18b   : > { %v839_v44 = vadd.f32 %v832_v14, %v797_v63  ;;  %v2928_v14 = vld [vmem:[#allocation7_spill] sm:$0xff] }
 0x18c   : > { %v361_v17 = vmul.f32 %v2281_v57, %v2928_v14  ;;  %v498_v57 = vmul.f32 %v2383_v31, %v2601_v29 }
 0x18d   : > { %v854_v32 = vpop.permute.xlu1 %853  ;;  %1140 = vrot.lane.b32.xlu1 %v1121_v18, %s1960_s12 }
 0x18e   : > { %v871_v28 = vmul.f32 %v854_v32, %v2378_v56  ;;  %v368_v32 = vadd.f32 %v361_v17, %v322_v35 }
 0x190   : > { %v878_v19 = vadd.f32 %v871_v28, %v836_v39  ;;  %v2931_v28 = vld [vmem:[#allocation9_spill] sm:$0xff] }
 0x191   : > { %1148 = vrot.lane.b32.xlu1 %v1124_v15, %s1961_s28  ;;  %v407_v36 = vmul.f32 %v2285_v11, %v2931_v28 }
 0x192   : > { %v489_v3 = vpop.permute.xlu1 %488 }
 0x193   : > { %v501_v26 = vmul.f32 %v2383_v31, %v489_v3  ;;  %v414_v48 = vadd.f32 %v407_v36, %v368_v32  ;;  %v2933_v3 = vld [vmem:[#allocation12_spill] sm:$0xff] }
 0x195   : > { %v2679_v63 = vadd.f32 %v501_v26, %v462_v53  ;;  %1156 = vrot.lane.b32.xlu1 %v2672_v16, %s1963_s7 }
 0x197   : > { %v523_v40 = vpop.permute.xlu1 %522 }
 0x198   : > { %v544_v26 = vmul.f32 %v2399_v20, %v523_v40 }
 0x19b   : > { %v527_v12 = vpop.permute.xlu1 %526 }
 0x19c   : > { %v545_v35 = vmul.f32 %v2399_v20, %v527_v12 }
 0x1a0   : > { %v866_v22 = vpop.permute.xlu1 %865 }
 0x1a1   : > { %v874_v2 = vmul.f32 %v866_v22, %v2378_v56 }
 0x1a3   : > { %v881_v27 = vadd.f32 %v874_v2, %v839_v44  ;;  %v2929_v44 = vld [vmem:[#allocation3_spill] sm:$0xff]  ;;  %v499_v2 = vmul.f32 %v2383_v31, %v2609_v5 }
 0x1a4   : > { %v321_v18 = vmul.f32 %v2272_v4, %v2929_v44  ;;  %v453_v4 = vmul.f32 %v2378_v56, %v2933_v3 }
 0x1a5   : > { %v896_v39 = vpop.permute.xlu1 %895 }
 0x1a6   : > { %v913_v9 = vmul.f32 %v896_v39, %v2383_v31  ;;  %v367_v37 = vadd.f32 %v360_v6, %v321_v18 }
 0x1a8   : > { %v2692_v30 = vadd.f32 %v913_v9, %v878_v19  ;;  %v413_v15 = vadd.f32 %v406_v50, %v367_v37  ;;  %v460_v9 = vadd.f32 %v453_v4, %v414_v48 }
 0x1aa   : > { %v535_v52 = vpop.permute.xlu1 %534  ;;  %v459_v53 = vadd.f32 %v452_v33, %v413_v15  ;;  %v506_v58 = vadd.f32 %v499_v2, %v460_v9  ;;  %v1042_v33 = vmul.f32 %v2555_v62, %v2417_v42  ;;  %v1379_v9 = vld [vmem:[#allocation2 + $0x28] sm:$0xf] }
 0x1ac   : > { %v505_v22 = vadd.f32 %v498_v57, %v459_v53  ;;  %v552_v17 = vadd.f32 %v545_v35, %v506_v58  ;;  %v547_v57 = vmul.f32 %v2399_v20, %v535_v52 }
 0x1ae   : > { %v551_v51 = vadd.f32 %v544_v26, %v505_v22  ;;  %v554_v4 = vadd.f32 %v547_v57, %v2679_v63 }
 0x1af   : > { %v569_v13 = vpop.permute.xlu1 %568 }
 0x1b0   : > { %v590_v11 = vmul.f32 %v2407_v8, %v569_v13 }
 0x1b2   : > { %v597_v6 = vadd.f32 %v590_v11, %v551_v51 }
 0x1b3   : > { %v573_v21 = vpop.permute.xlu1 %572 }
 0x1b4   : > { %v591_v56 = vmul.f32 %v2407_v8, %v573_v21 }
 0x1b6   : > { %v598_v18 = vadd.f32 %v591_v56, %v552_v17 }
 0x1b8   : > { %v908_v23 = vpop.permute.xlu1 %907 }
 0x1b9   : > { %v916_v45 = vmul.f32 %v908_v23, %v2383_v31 }
 0x1bb   : > { %v923_v36 = vadd.f32 %v916_v45, %v881_v27 }
 0x1bd   : > { %v2694_v38 = vpop.permute.xlu1 %937 }
 0x1be   : > { %v955_v63 = vmul.f32 %v2694_v38, %v2399_v20 }
 0x1c2   : > { %v581_v61 = vpop.permute.xlu1 %580 }
 0x1c7   : > { %v615_v1 = vpop.permute.xlu1 %614 }
 0x1c8   : > { %v636_v29 = vmul.f32 %v2417_v42, %v615_v1 }
 0x1ca   : > { %v643_v40 = vadd.f32 %v636_v29, %v597_v6  ;;  %v962_v29 = vadd.f32 %v955_v63, %v2692_v30 }
 0x1cb   : > { %v619_v46 = vpop.permute.xlu1 %618 }
 0x1cc   : > { %v637_v44 = vmul.f32 %v2417_v42, %v619_v46 }
 0x1ce   : > { %v644_v37 = vadd.f32 %v637_v44, %v598_v18 }
 0x1d0   : > { %v950_v47 = vpop.permute.xlu1 %949 }
 0x1d1   : > { %v958_v32 = vmul.f32 %v950_v47, %v2399_v20  ;;  %v593_v47 = vmul.f32 %v2407_v8, %v581_v61 }
 0x1d3   : > { %v965_v31 = vadd.f32 %v958_v32, %v923_v36  ;;  %v600_v62 = vadd.f32 %v593_v47, %v554_v4 }
 0x1d5   : > { %v980_v19 = vpop.permute.xlu1 %979 }
 0x1da   : > { %v627_v39 = vpop.permute.xlu1 %626 }
 0x1db   : > { %v639_v53 = vmul.f32 %v2417_v42, %v627_v39  ;;  %v997_v39 = vmul.f32 %v980_v19, %v2407_v8 }
 0x1dd   : > { %v646_v2 = vadd.f32 %v639_v53, %v600_v62  ;;  %v1004_v56 = vadd.f32 %v997_v39, %v962_v29 }
 0x1df   : > { %v661_v14 = vpop.permute.xlu1 %660 }
 0x1e0   : > { %v682_v5 = vmul.f32 %v2430_v43, %v661_v14 }
 0x1e2   : > { %v689_v13 = vadd.f32 %v682_v5, %v643_v40  ;;  %v1129_v40 = vpop.permute.xlu0 %1128 }
 0x1e3   : > { %v665_v50 = vpop.permute.xlu1 %664 }
 0x1e4   : > { %v702_v12 = vadd.f32 %v2450_v24, %v689_v13  ;;  %v683_v1 = vmul.f32 %v2430_v43, %v665_v50 }
 0x1e6   : > { %v709_v21 = vmax.f32 %v702_v12, 0.0  ;;  %v690_v28 = vadd.f32 %v683_v1, %v644_v37  ;;  %v1263_v37 = vld [vmem:[#allocation2 + $0x58] sm:$0xf]  ;;  %v1137_v12 = vpop.permute.xlu0 %1136 }
 0x1e8   : > { %717 = vst.msk [vmem:[#allocation2 + $0x18] sm:$0x1f] %vm713_vm0, %v709_v21  ;;  %v703_v46 = vadd.f32 %v2450_v24, %v690_v28  ;;  %v992_v60 = vpop.permute.xlu1 %991 }
 0x1e9   : > { %v1000_v23 = vmul.f32 %v992_v60, %v2407_v8 }
 0x1ea   : > { %v710_v15 = vmax.f32 %v703_v46, 0.0 }
 0x1eb   : > { %v1007_v48 = vadd.f32 %v1000_v23, %v965_v31  ;;  %v1145_v23 = vpop.permute.xlu0 %1144 }
 0x1ec   : > { %718 = vst.msk [vmem:[#allocation2 + $0x20] sm:$0x1f] %vm713_vm0, %v710_v15 }
 0x1ed   : > { %v1022_v27 = vpop.permute.xlu1 %1021  ;;  %v1049_v3 = vadd.f32 %v1042_v33, %v1007_v48 }
 0x1ee   : > { %v1039_v58 = vmul.f32 %v1022_v27, %v2417_v42 }
 0x1ef   : > { %v1257_v26 = vld [vmem:[#allocation2 + $0x18] sm:$0xf]  ;;  %v1153_v27 = vpop.permute.xlu0 %1152 }
 0x1f0   : > { %1267 = vrot.lane.b32.xlu0 %v1257_v26, %s1954_s13  ;;  %v1046_v17 = vadd.f32 %v1039_v58, %v1004_v56  ;;  %v1264_v62 = vld [vmem:[#allocation2 + $0x19] sm:$0xf] }
 0x1f2   : > { %v673_v22 = vpop.permute.xlu1 %672 }
 0x1f3   : > { %v685_v11 = vmul.f32 %v2430_v43, %v673_v22  ;;  %v2739_v52 = vld [vmem:[#allocation2 + $0x20] sm:$0xf] }
 0x1f4   : > { %1271 = vrot.lane.b32.xlu1 %v2739_v52, %s1959_s6  ;;  %1389 = vrot.lane.b32.xlu0 %v1379_v9, %s1954_s13  ;;  %v1265_v22 = vld [vmem:[#allocation2 + $0x21] sm:$0xf] }
 0x1f5   : > { %v692_v61 = vadd.f32 %v685_v11, %v646_v2 }
 0x1f7   : > { %v705_v51 = vadd.f32 %v2450_v24, %v692_v61  ;;  %v1030_v35 = vpop.permute.xlu1 %1029 }
 0x1f8   : > { %1274 = vrot.lane.b32.xlu1 %v2574_v55, %s1955_s14  ;;  %v1041_v20 = vmul.f32 %v1030_v35, %v2417_v42 }
 0x1f9   : > { %v712_v6 = vmax.f32 %v705_v51, 0.0 }
 0x1fa   : > { %v1048_v44 = vadd.f32 %v1041_v20, %v2597_v7  ;;  %v1114_v7 = vld [vmem:[#allocation2] sm:$0xf] }
 0x1fb   : > { %720 = vst.msk [vmem:[#allocation2 + $0x30] sm:$0x1f] %vm713_vm0, %v712_v6  ;;  %v1160_v21 = vsel %vm1159_vm2, %v1114_v7, %v1129_v40 }
 0x1fc   : > { %v1064_v14 = vpop.permute.xlu1 %1063 }
 0x1fd   : > { %v1081_v8 = vmul.f32 %v2430_v43, %v1064_v14 }
 0x1ff   : > { %v1088_v38 = vadd.f32 %v1081_v8, %v1046_v17 }
 0x200   : > { %v1072_v19 = vpop.permute.xlu1 %1071 }
 0x201   : > { %v1095_v55 = vadd.f32 %v2450_v24, %v1088_v38  ;;  %v1083_v30 = vmul.f32 %v2430_v43, %v1072_v19 }
 0x202   : > { %v1381_v5 = vld [vmem:[#allocation2 + $0x30] sm:$0xf] }
 0x203   : > { %v1102_v18 = vmax.f32 %v1095_v55, 0.0  ;;  %v1090_v13 = vadd.f32 %v1083_v30, %v1048_v44  ;;  %1393 = vrot.lane.b32.xlu0 %v1381_v5, %s1959_s6 }
 0x204   : > { %v1076_v45 = vpop.permute.xlu1 %1075 }
 0x205   : > { %1110 = vst.msk [vmem:[#allocation2 + $0x50] sm:$0x1f] %vm713_vm0, %v1102_v18  ;;  %v1097_v42 = vadd.f32 %v2450_v24, %v1090_v13  ;;  %v1084_v50 = vmul.f32 %v2430_v43, %v1076_v45 }
 0x207   : > { %v1104_v1 = vmax.f32 %v1097_v42, 0.0  ;;  %v1091_v32 = vadd.f32 %v1084_v50, %v1049_v3  ;;  %1396 = vrot.lane.b32.xlu0 %v1263_v37, %s1955_s14  ;;  %v1611_v42 = vld [vmem:[%s2848_s4] ss:$0 sm:$0xff] }
 0x208   : > { %v1133_v28 = vpop.permute.xlu1 %1132 }
 0x209   : > { %1112 = vst.msk [vmem:[#allocation2 + $0x60] sm:$0x1f] %vm713_vm0, %v1104_v1  ;;  %v1098_v36 = vadd.f32 %v2450_v24, %v1091_v32  ;;  %v1162_v46 = vsel %vm1161_vm3, %v1160_v21, %v1133_v28 }
 0x20a   : > { %v1164_v33 = vsel %vm1163_vm4, %v1162_v46, %v1137_v12 }
 0x20b   : > { %v1105_v43 = vmax.f32 %v1098_v36, 0.0 }
 0x20c   : > { %v1141_v60 = vpop.permute.xlu1 %1140  ;;  %v1261_v31 = vld [vmem:[#allocation2 + $0x50] sm:$0xf] }
 0x20d   : > { %1113 = vst.msk [vmem:[#allocation2 + $0x68] sm:$0x1f] %vm713_vm0, %v1105_v43  ;;  %v1166_v15 = vsel %vm1165_vm5, %v1164_v33, %v1141_v60  ;;  %1278 = vrot.lane.b32.xlu1 %v1261_v31, %s1960_s12 }
 0x20e   : > { %v1168_v24 = vsel %vm1167_vm6, %v1166_v15, %v1145_v23 }
 0x210   : > { %v1149_v57 = vpop.permute.xlu1 %1148  ;;  %v1383_v48 = vld [vmem:[#allocation2 + $0x60] sm:$0xf] }
 0x211   : > { %v1170_v47 = vsel %vm1169_vm7, %v1168_v24, %v1149_v57  ;;  %1282 = vrot.lane.b32.xlu1 %v1263_v37, %s1956_s15  ;;  %1400 = vrot.lane.b32.xlu0 %v1383_v48, %s1960_s12 }
 0x212   : > { %v1172_v4 = vsel %vm1171_vm8, %v1170_v47, %v1153_v27 }
 0x214   : > { %v1157_v3 = vpop.permute.xlu1 %1156  ;;  %v1385_v53 = vld [vmem:[#allocation2 + $0x68] sm:$0xf] }
 0x215   : > { %v1174_v26 = vsel %vm1173_vm9, %v1172_v4, %v1157_v3  ;;  %1285 = vrot.lane.b32.xlu1 %v2672_v16, %s1961_s28  ;;  %1404 = vrot.lane.b32.xlu0 %v1385_v53, %s1956_s15  ;;  %v1386_v16 = vld [vmem:[#allocation2 + $0x29] sm:$0xf] }
 0x216   : > { %1666 = vmatmul.mubr.msk.f32.vlgmr.msra.gmra.mrb[0].mxu0 %vm1181_vm10, %v1174_v26 }
 0x217   : > { %1736 = vmatpush3.bf16.msra.mxu0 %v2611_v34  ;;  %1707 = vmatprep.mubr.msk.f32.mxu0 %vm1964_vm1, %v1962_v0  ;;  %v1387_v34 = vld [vmem:[#allocation2 + $0x31] sm:$0xf] }
 0x218   : > { %1737 = vmatprep.subr.bf16.mxu0 %v1958_v49 }
 0x219   : > { %1289 = vrot.lane.b32.xlu1 %v1264_v62, %s1957_s16  ;;  %1407 = vrot.lane.b32.xlu0 %v1265_v22, %s1961_s28 }
 0x21b   : > { %1739 = vmatpush3.bf16.msra.mxu0 %v2625_v59 }
 0x21c   : > { %1740 = vmatprep.subr.bf16.mxu0 %v1958_v49 }
 0x21d   : > { %1293 = vrot.lane.b32.xlu1 %v1265_v22, %s1963_s7  ;;  %1411 = vrot.lane.b32.xlu0 %v1386_v16, %s1957_s16  ;;  %s1607_s16 = sshll.u32 %s2945_s19, 1 }
 0x21e   : > { %s256_s8 = sadd.s32 %s1607_s16, %s2947_s18 }
 0x21f   : > { %1742 = vmatpush3.bf16.msra.mxu0 %v2646_v25  ;;  %s1608_s9 = sshll.u32 %s256_s8, 2 }
 0x220   : > { %1743 = vmatprep.subr.bf16.mxu0 %v1958_v49  ;;  %s258_s12 = scalar_lea.vmem %s2849_s5, %s1608_s9 }
 0x221   : > { %1415 = vrot.lane.b32.xlu1 %v1387_v34, %s1963_s7 }
 0x223   : > { %1745 = vmatpush3.bf16.msra.mxu0 %v2663_v41 }
 0x224   : > { %1705 = vmatprep.subr.mxu0 %v1962_v0 }
 0x227   : > { %1706 = vmatpush3.msra.mxu0 %v2677_v10 }
 0x262   : > { %v1268_v59 = vpop.permute.xlu0 %1267 }
 0x263   : > { %v1296_v49 = vsel %vm1159_vm2, %v2628_v54, %v1268_v59 }
 0x266   : > { %v1272_v2 = vpop.permute.xlu1 %1271  ;;  %v1390_v11 = vpop.permute.xlu0 %1389 }
 0x267   : > { %v1297_v41 = vsel %vm1161_vm3, %v1296_v49, %v1272_v2  ;;  %v1418_v56 = vsel %vm1159_vm2, %v2739_v52, %v1390_v11 }
 0x26a   : > { %v1275_v63 = vpop.permute.xlu1 %1274 }
 0x26b   : > { %v1298_v0 = vsel %vm1163_vm4, %v1297_v41, %v1275_v63 }
 0x275   : > { %v1394_v9 = vpop.permute.xlu0 %1393 }
 0x276   : > { %v1419_v17 = vsel %vm1161_vm3, %v1418_v56, %v1394_v9 }
 0x279   : > { %v1397_v61 = vpop.permute.xlu0 %1396 }
 0x27a   : > { %v1420_v8 = vsel %vm1163_vm4, %v1419_v17, %v1397_v61 }
 0x27f   : > { %v1279_v39 = vpop.permute.xlu1 %1278 }
 0x280   : > { %v1299_v6 = vsel %vm1165_vm5, %v1298_v0, %v1279_v39 }
 0x283   : > { %v1283_v51 = vpop.permute.xlu1 %1282  ;;  %v1401_v25 = vpop.permute.xlu0 %1400 }
 0x284   : > { %v1300_v14 = vsel %vm1167_vm6, %v1299_v6, %v1283_v51  ;;  %v1421_v19 = vsel %vm1165_vm5, %v1420_v8, %v1401_v25 }
 0x287   : > { %v1286_v35 = vpop.permute.xlu1 %1285  ;;  %v1405_v29 = vpop.permute.xlu0 %1404 }
 0x288   : > { %v1301_v20 = vsel %vm1169_vm7, %v1300_v14, %v1286_v35  ;;  %v1422_v55 = vsel %vm1167_vm6, %v1421_v19, %v1405_v29 }
 0x28b   : > { %v1290_v58 = vpop.permute.xlu1 %1289  ;;  %v1408_v10 = vpop.permute.xlu0 %1407 }
 0x28c   : > { %v1302_v54 = vsel %vm1171_vm8, %v1301_v20, %v1290_v58  ;;  %v1423_v52 = vsel %vm1169_vm7, %v1422_v55, %v1408_v10 }
 0x28f   : > { %v1294_v38 = vpop.permute.xlu1 %1293  ;;  %v1412_v44 = vpop.permute.xlu0 %1411 }
 0x290   : > { %v1303_v40 = vsel %vm1173_vm9, %v1302_v54, %v1294_v38  ;;  %v1424_v30 = vsel %vm1171_vm8, %v1423_v52, %v1412_v44 }
 0x291   : > { %1687 = vmatmul.mubr.msk.f32.vlgmr.msra.gmra.mrb[0].mxu1 %vm1181_vm10, %v1303_v40 }
 0x293   : > { %v1416_v5 = vpop.permute.xlu1 %1415 }
 0x294   : > { %v1425_v18 = vsel %vm1173_vm9, %v1424_v30, %v1416_v5 }
 0x295   : > { %1708 = vmatmul.mubr.msk.f32.vlgmr.msra.gmra.mrb[2].mxu0 %vm1181_vm10, %v1425_v18 }
 0x2e9   : > { %v1251_v13 = vpop.f32.mrb[0].mxu0 }
 0x2ea   : > { %v1667_v45 = vpop.f32.mrb[1].mxu0  ;;  %v1252_v36 = vadd.f32 %v1611_v42, %v1251_v13 }
 0x2ec   : > { %v1255_v43 = vmax.f32 %v1252_v36, 0.0 }
 0x364   : > { %v1373_v50 = vpop.f32.mrb[0].mxu1 }
 0x365   : > { %v1374_v37 = vadd.f32 %v1611_v42, %v1373_v50  ;;  %v1688_v7 = vpop.f32.mrb[1].mxu1 }
 0x367   : > { %v1377_v12 = vmax.f32 %v1374_v37, 0.0 }
 0x368   : > { %v1495_v1 = vpop.f32.mrb[2].mxu0 }
 0x369   : > { %v1496_v32 = vadd.f32 %v1611_v42, %v1495_v1  ;;  %1501 = vrot.lane.b32.xlu0 %v1377_v12, %s1954_s13  ;;  %v1709_v21 = vpop.f32.mrb[3].mxu0 }
 0x36b   : > { %v1499_v28 = vmax.f32 %v1496_v32, 0.0 }
 0x36d   : > { %1505 = vrot.lane.b32.xlu1 %v1499_v28, %s1959_s6 }
 0x3db   : > { %v1502_v46 = vpop.permute.xlu0 %1501 }
 0x3dc   : > { %v1508_v60 = vsel %vm1159_vm2, %v1255_v43, %v1502_v46 }
 0x3df   : > { %v1506_v33 = vpop.permute.xlu1 %1505 }
 0x3e0   : > { %v1509_v31 = vsel %vm1161_vm3, %v1508_v60, %v1506_v33 }
 0x3e1   : > { %1511 = vst.msk [vmem:[%s258_s12] sm:$0xf] %vm1510_vm11, %v1509_v31 }
 0x3e2 PF: > { %s15_s22 = sadd.s32 1, %s1934_s22   ;;  %s2934_s18 = smov %s1926_s20 }
 0x3e3   : > { %p12_p7 = scmp.ge.s32.totalorder %s15_s22, 6   ;;  %s2935_s19 = smov %s1930_s21 }
 0x3e4   : > { %s2936_s20 = smov %s2939_s23  ;;  %s2937_s21 = smov %s2943_s24 }
 0x3e5   :  { %14 = sbr.rel (!%p12_p7) target bundleno = 3 (0x3), region = 83 }

</bundles_post_ra>
